<compile_context>
chip_gen: v7x
topology: tpu7x:2x2x1
jax: 0.10.0
libtpu: 0.0.40
codegen_flags: <defaults>
</compile_context>

<pallas_src>
import jax
import jax.numpy as jnp
from jax import lax
from jax.experimental import pallas as pl
from jax.experimental.pallas import tpu as pltpu


def lstm_regression_kernel(x_ref,                       # (T*B, D)  chunk, rows = t*B + b
                           wih0_ref,                    # (D, 4H)
                           w01_ref,                     # (H, 8H)  = [wih1 | whh0] fused
                           whh1_ref,                    # (H, 4H)
                           b0_ref, b1_ref,              # (1, 4H) each (b_ih + b_hh pre-summed)
                           wfc_ref, bfc_ref,            # (H, Opad), (1, Opad)  lane-padded FC
                           out_ref,                     # (T*B, Opad)
                           h1_buf,                      # VMEM (T*B, H) chunk h1 accumulator
                           rec0_s,                      # VMEM (B, 4H)  carried h0 @ whh0
                           c0_s, h1_s, c1_s):           # VMEM (B, H) persistent state
    B, H = c0_s.shape
    T = x_ref.shape[0] // B

    @pl.when(pl.program_id(0) == 0)
    def _():
        rec0_s[...] = jnp.zeros_like(rec0_s)   # h0 init = 0  =>  h0 @ whh0 = 0
        c0_s[...] = jnp.zeros_like(c0_s)
        h1_s[...] = jnp.zeros_like(h1_s)
        c1_s[...] = jnp.zeros_like(c1_s)

    # One big MXU op for every layer-0 input-gate contribution in the chunk
    # (T small per-step matmuls -> 1 matmul with M = T*B; bias folded in).
    xg0 = (jnp.dot(x_ref[...], wih0_ref[...],
                   preferred_element_type=jnp.float32) + b0_ref[...])

    # Hoist weight loads out of the unrolled time loop.
    w01 = w01_ref[...]
    whh1 = whh1_ref[...]
    b1 = b1_ref[...]

    def gate_act(gates, c_prev):
        # PyTorch gate order [i, f, g, o].  Two full-vreg transcendentals + lane slices
        # instead of 4 separate 32-lane ones (EUP is a single slot on the serial chain).
        s = jax.nn.sigmoid(gates)
        tg = jnp.tanh(gates)
        i = s[:, 0 * H:1 * H]
        f = s[:, 1 * H:2 * H]
        g = tg[:, 2 * H:3 * H]
        o = s[:, 3 * H:4 * H]
        c_new = f * c_prev + i * g
        h_new = o * jnp.tanh(c_new)
        return h_new, c_new

    # Recurrent state lives in vregs for the whole chunk (no per-step VMEM round trips).
    rec0 = rec0_s[...]                 # h0(t-1) @ whh0, carried across steps/chunks
    c0 = c0_s[...]
    h1, c1 = h1_s[...], c1_s[...]

    # Fully-unrolled time loop: T is small & static, so every slice offset is static
    # and the LLO scheduler sees the whole chunk.
    # TODO(synk): for production H (>=512) / large T switch to lax.fori_loop with
    # 8-row-aligned state-buffer slices to bound live ranges.
    for t in range(T):
        g0 = xg0[t * B:(t + 1) * B, :] + rec0
        h0, c0 = gate_act(g0, c0)
        # Single fused MXU push: lanes [0:4H] = h0 @ wih1 (layer-1 gates, step t),
        # lanes [4H:8H] = h0 @ whh0 (layer-0 recurrence, step t+1).
        fused = jnp.dot(h0, w01, preferred_element_type=jnp.float32)   # (B, 8H)
        g1 = (fused[:, :4 * H]
              + jnp.dot(h1, whh1, preferred_element_type=jnp.float32) + b1)
        h1, c1 = gate_act(g1, c1)
        rec0 = fused[:, 4 * H:]
        h1_buf[t * B:(t + 1) * B, :] = h1          # 8-row-aligned store (B % 8 == 0)

    # Persist state for the next time chunk.
    rec0_s[...] = rec0
    c0_s[...] = c0
    h1_s[...] = h1
    c1_s[...] = c1

    # Deferred FC: one (T*B, H) @ (H, Opad) matmul + one lane-dense chunk-wide store.
    out_ref[...] = (jnp.dot(h1_buf[...], wfc_ref[...],
                            preferred_element_type=jnp.float32)
                    + bfc_ref[...]).astype(out_ref.dtype)


def lstm_regression(x, params, *, t_chunk=64):
    """x: (S, B, D) float32. params: dict of weights (stored transposed for x @ W)."""
    S, B, D = x.shape
    H = params["whh0"].shape[0]
    O = params["wfc"].shape[1]

    # ---- sublane-pad batch to a multiple of 8 (f32 sublanes) ----
    B_pad = max(8, -(-B // 8) * 8)
    if B_pad != B:
        x = jnp.concatenate([x, jnp.zeros((S, B_pad - B, D), x.dtype)], axis=1)

    # ---- lane-pad the FC output to 128 lanes (dense stores, no N=1 MXU pass) ----
    O_pad = max(128, -(-O // 128) * 128)
    wfc = jnp.zeros((H, O_pad), jnp.float32).at[:, :O].set(params["wfc"])
    bfc = jnp.zeros((1, O_pad), jnp.float32).at[:, :O].set(params["bfc"])

    # ---- fuse [wih1 | whh0] so layer-1 input + layer-0 recurrence share one MXU push ----
    w01 = jnp.concatenate([params["wih1"], params["whh0"]], axis=1)     # (H, 8H)

    # ---- chunking over time (amortize per-grid-step overhead) ----
    t_chunk = max(1, min(t_chunk, S))
    n_chunks = -(-S // t_chunk)
    S_pad = n_chunks * t_chunk
    if S_pad != S:
        # Zero-pad trailing timesteps; recurrence is causal so padded outputs are dropped.
        x = jnp.concatenate([x, jnp.zeros((S_pad - S, B_pad, D), x.dtype)], axis=0)

    # Flatten time/batch: kernel sees 2-D blocks with rows = t*B_pad + b (the PyTorch
    # view(s*b, h) layout) — no in-kernel reshapes, lane-packed chunk stores.
    x2d = x.reshape(S_pad * B_pad, D)
    TB = t_chunk * B_pad

    full = lambda shape: pl.BlockSpec(shape, lambda c: (0,) * len(shape))

    # ---- generation-aware VMEM budget (f32, inputs double-buffered) ----
    f32b = 4
    w_bytes = f32b * (D * 4 * H + H * 8 * H + H * 4 * H + 2 * 4 * H + H * O_pad + O_pad)
    io_bytes = f32b * (TB * D + TB * O_pad)
    scratch_bytes = f32b * (TB * H + B_pad * 4 * H + 3 * B_pad * H)
    need = 2 * (2 * (w_bytes + io_bytes) + scratch_bytes)
    try:
        vmem_cap = int(pltpu.get_tpu_info().vmem_capacity_bytes)
    except Exception:
        vmem_cap = 64 * 2 ** 20                       # conservative (v7x) fallback
    vmem_limit = int(min(max(need, 16 * 2 ** 20),
                         max(vmem_cap - 8 * 2 ** 20, 16 * 2 ** 20)))

    out2d = pl.pallas_call(
        lstm_regression_kernel,
        out_shape=jax.ShapeDtypeStruct((S_pad * B_pad, O_pad), jnp.float32),
        grid_spec=pltpu.PrefetchScalarGridSpec(
            num_scalar_prefetch=0,
            grid=(n_chunks,),
            in_specs=[
                pl.BlockSpec((TB, D), lambda c: (c, 0)),     # x chunk
                full((D, 4 * H)),                            # wih0
                full((H, 8 * H)),                            # [wih1 | whh0]
                full((H, 4 * H)),                            # whh1
                full((1, 4 * H)), full((1, 4 * H)),          # b0, b1
                full((H, O_pad)), full((1, O_pad)),          # fc (lane-padded)
            ],
            out_specs=pl.BlockSpec((TB, O_pad), lambda c: (c, 0)),
            scratch_shapes=[
                pltpu.VMEM((TB, H), jnp.float32),        # h1 accumulator for the chunk
                pltpu.VMEM((B_pad, 4 * H), jnp.float32), # rec0 = h0 @ whh0 carry
                pltpu.VMEM((B_pad, H), jnp.float32),     # c0
                pltpu.VMEM((B_pad, H), jnp.float32),     # h1
                pltpu.VMEM((B_pad, H), jnp.float32),     # c1
            ],
        ),
        compiler_params=pltpu.CompilerParams(
            dimension_semantics=("arbitrary",),          # time chunks are sequential
            vmem_limit_bytes=vmem_limit,
        ),
    )(x2d,
      params["wih0"], w01, params["whh1"],
      params["b0"], params["b1"],
      wfc, bfc)

    return out2d.reshape(S_pad, B_pad, O_pad)[:S, :B, :O]


def make_params(key, input_size, hidden_size, output_size):
    """Deterministic init, PyTorch-style uniform(-1/sqrt(H), 1/sqrt(H)).
    Weights stored transposed so the kernel computes x @ W directly; the per-layer
    biases b_ih + b_hh are pre-summed into a single bias."""
    H = hidden_size
    k = 1.0 / jnp.sqrt(jnp.float32(H))
    keys = jax.random.split(key, 10)
    u = lambda kk, shape: jax.random.uniform(kk, shape, jnp.float32, -k, k)

    return {
        # layer 0
        "wih0": u(keys[0], (input_size, 4 * H)),
        "whh0": u(keys[1], (H, 4 * H)),
        "b0":   (u(keys[2], (1, 4 * H)) + u(keys[3], (1, 4 * H))),
        # layer 1
        "wih1": u(keys[4], (H, 4 * H)),
        "whh1": u(keys[5], (H, 4 * H)),
        "b1":   (u(keys[6], (1, 4 * H)) + u(keys[7], (1, 4 * H))),
        # fc
        "wfc":  u(keys[8], (H, output_size)),
        "bfc":  u(keys[9], (1, output_size)),
    }


def lstm_regression_ref(x, params):
    """Pure-JAX reference (lax.scan) for correctness checking."""
    S, B, D = x.shape
    H = params["whh0"].shape[0]

    def cell(x_in, h, c, wih, whh, b):
        gates = x_in @ wih + h @ whh + b
        i = jax.nn.sigmoid(gates[:, 0 * H:1 * H])
        f = jax.nn.sigmoid(gates[:, 1 * H:2 * H])
        g = jnp.tanh(gates[:, 2 * H:3 * H])
        o = jax.nn.sigmoid(gates[:, 3 * H:4 * H])
        c_new = f * c + i * g
        h_new = o * jnp.tanh(c_new)
        return h_new, c_new

    def step(carry, x_t):
        h0, c0, h1, c1 = carry
        h0, c0 = cell(x_t, h0, c0, params["wih0"], params["whh0"], params["b0"])
        h1, c1 = cell(h0, h1, c1, params["wih1"], params["whh1"], params["b1"])
        y_t = h1 @ params["wfc"] + params["bfc"]
        return (h0, c0, h1, c1), y_t

    z = jnp.zeros((B, H), jnp.float32)
    _, ys = lax.scan(step, (z, z, z, z), x)
    return ys  # (S, B, O)


if __name__ == "__main__":
    SEQ, BATCH, INPUT, HIDDEN, OUTPUT = 8, 2, 8, 32, 1

    key = jax.random.PRNGKey(0)
    kx, kp = jax.random.split(key)
    x = jax.random.normal(kx, (SEQ, BATCH, INPUT), jnp.float32)
    params = make_params(kp, INPUT, HIDDEN, OUTPUT)

    out = lstm_regression(x, params)
    out = jax.block_until_ready(out)

    ref = lstm_regression_ref(x, params)
    assert out.shape == (SEQ, BATCH, OUTPUT)
    assert jnp.allclose(out, ref, atol=2e-5, rtol=2e-5), "mismatch vs reference"

    print("KERNEL_OK")
</pallas_src>

<mosaic_0001>
module attributes {stable_mosaic.version = 11 : i64} {
  func.func @lstm_regression_kernel(%arg0: i32, %arg1: memref<64x8xf32, #tpu.memory_space<vmem>>, %arg2: memref<8x128xf32, #tpu.memory_space<vmem>>, %arg3: memref<32x256xf32, #tpu.memory_space<vmem>>, %arg4: memref<32x128xf32, #tpu.memory_space<vmem>>, %arg5: memref<1x128xf32, #tpu.memory_space<vmem>>, %arg6: memref<1x128xf32, #tpu.memory_space<vmem>>, %arg7: memref<32x128xf32, #tpu.memory_space<vmem>>, %arg8: memref<1x128xf32, #tpu.memory_space<vmem>>, %arg9: memref<64x128xf32, #tpu.memory_space<vmem>>, %arg10: memref<64x32xf32, #tpu.memory_space<vmem>>, %arg11: memref<8x128xf32, #tpu.memory_space<vmem>>, %arg12: memref<8x32xf32, #tpu.memory_space<vmem>>, %arg13: memref<8x32xf32, #tpu.memory_space<vmem>>, %arg14: memref<8x32xf32, #tpu.memory_space<vmem>>) attributes {dimension_semantics = [#tpu.dimension_semantics<arbitrary>], iteration_bounds = array<i64: 1>, scalar_prefetch = 0 : i64, scratch_operands = 5 : i64, tpu.core_type = #tpu.core_type<tc>, window_params = [{transform_indices = @transform_0, window_bounds = array<i64: 64, 8>}, {pipeline_mode = #tpu.pipeline_mode<synchronous>, transform_indices = @transform_1, window_bounds = array<i64: 8, 128>}, {pipeline_mode = #tpu.pipeline_mode<synchronous>, transform_indices = @transform_2, window_bounds = array<i64: 32, 256>}, {pipeline_mode = #tpu.pipeline_mode<synchronous>, transform_indices = @transform_3, window_bounds = array<i64: 32, 128>}, {pipeline_mode = #tpu.pipeline_mode<synchronous>, transform_indices = @transform_4, window_bounds = array<i64: 1, 128>}, {pipeline_mode = #tpu.pipeline_mode<synchronous>, transform_indices = @transform_5, window_bounds = array<i64: 1, 128>}, {pipeline_mode = #tpu.pipeline_mode<synchronous>, transform_indices = @transform_6, window_bounds = array<i64: 32, 128>}, {pipeline_mode = #tpu.pipeline_mode<synchronous>, transform_indices = @transform_7, window_bounds = array<i64: 1, 128>}, {transform_indices = @transform_8, window_bounds = array<i64: 64, 128>}]} {
    %c0_i32 = arith.constant 0 : i32
    %0 = arith.cmpi eq, %arg0, %c0_i32 : i32
    %1 = arith.extui %0 : i1 to i32
    %c0_i32_0 = arith.constant 0 : i32
    %2 = arith.cmpi ne, %1, %c0_i32_0 : i32
    scf.if %2 {
      %cst_78 = arith.constant 0.000000e+00 : f32
      %347 = vector.broadcast %cst_78 : f32 to vector<8x128xf32>
      %c0_79 = arith.constant 0 : index
      %c0_80 = arith.constant 0 : index
      %348 = vector.load %arg11[%c0_79, %c0_80] : memref<8x128xf32, #tpu.memory_space<vmem>>, vector<8x128xf32>
      tpu.vector_store %arg11[%c0_79, %c0_80], %347 {strides = array<i32>} : memref<8x128xf32, #tpu.memory_space<vmem>>, vector<8x128xf32>,
      %cst_81 = arith.constant 0.000000e+00 : f32
      %349 = vector.broadcast %cst_81 : f32 to vector<8x32xf32>
      %c0_82 = arith.constant 0 : index
      %c0_83 = arith.constant 0 : index
      %350 = vector.load %arg12[%c0_82, %c0_83] : memref<8x32xf32, #tpu.memory_space<vmem>>, vector<8x32xf32>
      tpu.vector_store %arg12[%c0_82, %c0_83], %349 {strides = array<i32>} : memref<8x32xf32, #tpu.memory_space<vmem>>, vector<8x32xf32>,
      %cst_84 = arith.constant 0.000000e+00 : f32
      %351 = vector.broadcast %cst_84 : f32 to vector<8x32xf32>
      %c0_85 = arith.constant 0 : index
      %c0_86 = arith.constant 0 : index
      %352 = vector.load %arg13[%c0_85, %c0_86] : memref<8x32xf32, #tpu.memory_space<vmem>>, vector<8x32xf32>
      tpu.vector_store %arg13[%c0_85, %c0_86], %351 {strides = array<i32>} : memref<8x32xf32, #tpu.memory_space<vmem>>, vector<8x32xf32>,
      %cst_87 = arith.constant 0.000000e+00 : f32
      %353 = vector.broadcast %cst_87 : f32 to vector<8x32xf32>
      %c0_88 = arith.constant 0 : index
      %c0_89 = arith.constant 0 : index
      %354 = vector.load %arg14[%c0_88, %c0_89] : memref<8x32xf32, #tpu.memory_space<vmem>>, vector<8x32xf32>
      tpu.vector_store %arg14[%c0_88, %c0_89], %353 {strides = array<i32>} : memref<8x32xf32, #tpu.memory_space<vmem>>, vector<8x32xf32>,
    } else {
    }
    %c0 = arith.constant 0 : index
    %c0_1 = arith.constant 0 : index
    %3 = vector.load %arg1[%c0, %c0_1] : memref<64x8xf32, #tpu.memory_space<vmem>>, vector<64x8xf32>
    %c0_2 = arith.constant 0 : index
    %c0_3 = arith.constant 0 : index
    %4 = vector.load %arg2[%c0_2, %c0_3] : memref<8x128xf32, #tpu.memory_space<vmem>>, vector<8x128xf32>
    %cst = arith.constant dense<0.000000e+00> : vector<64x128xf32>
    %5 = tpu.matmul %3, %4, %cst {dimension_numbers = #tpu.dot_dimension_numbers<[1], [0], [0], [1], [0, 0, 1, 1], [], []>} : vector<64x8xf32>, vector<8x128xf32>, vector<64x128xf32> -> vector<64x128xf32>
    %c0_4 = arith.constant 0 : index
    %c0_5 = arith.constant 0 : index
    %6 = vector.load %arg5[%c0_4, %c0_5] : memref<1x128xf32, #tpu.memory_space<vmem>>, vector<1x128xf32>
    %7 = vector.broadcast %6 : vector<1x128xf32> to vector<64x128xf32>
    %8 = arith.addf %5, %7 : vector<64x128xf32>
    %c0_6 = arith.constant 0 : index
    %c0_7 = arith.constant 0 : index
    %9 = vector.load %arg3[%c0_6, %c0_7] : memref<32x256xf32, #tpu.memory_space<vmem>>, vector<32x256xf32>
    %c0_8 = arith.constant 0 : index
    %c0_9 = arith.constant 0 : index
    %10 = vector.load %arg4[%c0_8, %c0_9] : memref<32x128xf32, #tpu.memory_space<vmem>>, vector<32x128xf32>
    %c0_10 = arith.constant 0 : index
    %c0_11 = arith.constant 0 : index
    %11 = vector.load %arg6[%c0_10, %c0_11] : memref<1x128xf32, #tpu.memory_space<vmem>>, vector<1x128xf32>
    %c0_12 = arith.constant 0 : index
    %c0_13 = arith.constant 0 : index
    %12 = vector.load %arg11[%c0_12, %c0_13] : memref<8x128xf32, #tpu.memory_space<vmem>>, vector<8x128xf32>
    %c0_14 = arith.constant 0 : index
    %c0_15 = arith.constant 0 : index
    %13 = vector.load %arg12[%c0_14, %c0_15] : memref<8x32xf32, #tpu.memory_space<vmem>>, vector<8x32xf32>
    %c0_16 = arith.constant 0 : index
    %c0_17 = arith.constant 0 : index
    %14 = vector.load %arg13[%c0_16, %c0_17] : memref<8x32xf32, #tpu.memory_space<vmem>>, vector<8x32xf32>
    %c0_18 = arith.constant 0 : index
    %c0_19 = arith.constant 0 : index
    %15 = vector.load %arg14[%c0_18, %c0_19] : memref<8x32xf32, #tpu.memory_space<vmem>>, vector<8x32xf32>
    %16 = vector.extract_strided_slice %8 {offsets = [0, 0], sizes = [8, 128], strides = [1, 1]} : vector<64x128xf32> to vector<8x128xf32>
    %17 = arith.addf %16, %12 : vector<8x128xf32>
    %18 = arith.negf %17 : vector<8x128xf32>
    %19 = math.exp %18 : vector<8x128xf32>
    %cst_20 = arith.constant 1.000000e+00 : f32
    %20 = vector.broadcast %cst_20 : f32 to vector<8x128xf32>
    %21 = arith.addf %20, %19 : vector<8x128xf32>
    %22 = arith.divf %20, %21 : vector<8x128xf32>
    %23 = math.tanh %17 : vector<8x128xf32>
    %24 = vector.extract_strided_slice %22 {offsets = [0, 0], sizes = [8, 32], strides = [1, 1]} : vector<8x128xf32> to vector<8x32xf32>
    %25 = vector.extract_strided_slice %22 {offsets = [0, 32], sizes = [8, 32], strides = [1, 1]} : vector<8x128xf32> to vector<8x32xf32>
    %26 = vector.extract_strided_slice %23 {offsets = [0, 64], sizes = [8, 32], strides = [1, 1]} : vector<8x128xf32> to vector<8x32xf32>
    %27 = vector.extract_strided_slice %22 {offsets = [0, 96], sizes = [8, 32], strides = [1, 1]} : vector<8x128xf32> to vector<8x32xf32>
    %28 = arith.mulf %25, %13 : vector<8x32xf32>
    %29 = arith.mulf %24, %26 : vector<8x32xf32>
    %30 = arith.addf %28, %29 : vector<8x32xf32>
    %31 = math.tanh %30 : vector<8x32xf32>
    %32 = arith.mulf %27, %31 : vector<8x32xf32>
    %cst_21 = arith.constant dense<0.000000e+00> : vector<8x256xf32>
    %33 = tpu.matmul %32, %9, %cst_21 {dimension_numbers = #tpu.dot_dimension_numbers<[1], [0], [0], [1], [0, 0, 1, 1], [], []>} : vector<8x32xf32>, vector<32x256xf32>, vector<8x256xf32> -> vector<8x256xf32>
    %34 = vector.extract_strided_slice %33 {offsets = [0, 0], sizes = [8, 128], strides = [1, 1]} : vector<8x256xf32> to vector<8x128xf32>
    %cst_22 = arith.constant dense<0.000000e+00> : vector<8x128xf32>
    %35 = tpu.matmul %14, %10, %cst_22 {dimension_numbers = #tpu.dot_dimension_numbers<[1], [0], [0], [1], [0, 0, 1, 1], [], []>} : vector<8x32xf32>, vector<32x128xf32>, vector<8x128xf32> -> vector<8x128xf32>
    %36 = arith.addf %34, %35 : vector<8x128xf32>
    %37 = vector.broadcast %11 : vector<1x128xf32> to vector<8x128xf32>
    %38 = arith.addf %36, %37 : vector<8x128xf32>
    %39 = arith.negf %38 : vector<8x128xf32>
    %40 = math.exp %39 : vector<8x128xf32>
    %cst_23 = arith.constant 1.000000e+00 : f32
    %41 = vector.broadcast %cst_23 : f32 to vector<8x128xf32>
    %42 = arith.addf %41, %40 : vector<8x128xf32>
    %43 = arith.divf %41, %42 : vector<8x128xf32>
    %44 = math.tanh %38 : vector<8x128xf32>
    %45 = vector.extract_strided_slice %43 {offsets = [0, 0], sizes = [8, 32], strides = [1, 1]} : vector<8x128xf32> to vector<8x32xf32>
    %46 = vector.extract_strided_slice %43 {offsets = [0, 32], sizes = [8, 32], strides = [1, 1]} : vector<8x128xf32> to vector<8x32xf32>
    %47 = vector.extract_strided_slice %44 {offsets = [0, 64], sizes = [8, 32], strides = [1, 1]} : vector<8x128xf32> to vector<8x32xf32>
    %48 = vector.extract_strided_slice %43 {offsets = [0, 96], sizes = [8, 32], strides = [1, 1]} : vector<8x128xf32> to vector<8x32xf32>
    %49 = arith.mulf %46, %15 : vector<8x32xf32>
    %50 = arith.mulf %45, %47 : vector<8x32xf32>
    %51 = arith.addf %49, %50 : vector<8x32xf32>
    %52 = math.tanh %51 : vector<8x32xf32>
    %53 = arith.mulf %48, %52 : vector<8x32xf32>
    %54 = vector.extract_strided_slice %33 {offsets = [0, 128], sizes = [8, 128], strides = [1, 1]} : vector<8x256xf32> to vector<8x128xf32>
    %c0_24 = arith.constant 0 : index
    %c0_25 = arith.constant 0 : index
    %55 = vector.load %arg10[%c0_24, %c0_25] : memref<64x32xf32, #tpu.memory_space<vmem>>, vector<8x32xf32>
    tpu.vector_store %arg10[%c0_24, %c0_25], %53 {strides = array<i32>} : memref<64x32xf32, #tpu.memory_space<vmem>>, vector<8x32xf32>,
    %56 = vector.extract_strided_slice %8 {offsets = [8, 0], sizes = [8, 128], strides = [1, 1]} : vector<64x128xf32> to vector<8x128xf32>
    %57 = arith.addf %56, %54 : vector<8x128xf32>
    %58 = arith.negf %57 : vector<8x128xf32>
    %59 = math.exp %58 : vector<8x128xf32>
    %cst_26 = arith.constant 1.000000e+00 : f32
    %60 = vector.broadcast %cst_26 : f32 to vector<8x128xf32>
    %61 = arith.addf %60, %59 : vector<8x128xf32>
    %62 = arith.divf %60, %61 : vector<8x128xf32>
    %63 = math.tanh %57 : vector<8x128xf32>
    %64 = vector.extract_strided_slice %62 {offsets = [0, 0], sizes = [8, 32], strides = [1, 1]} : vector<8x128xf32> to vector<8x32xf32>
    %65 = vector.extract_strided_slice %62 {offsets = [0, 32], sizes = [8, 32], strides = [1, 1]} : vector<8x128xf32> to vector<8x32xf32>
    %66 = vector.extract_strided_slice %63 {offsets = [0, 64], sizes = [8, 32], strides = [1, 1]} : vector<8x128xf32> to vector<8x32xf32>
    %67 = vector.extract_strided_slice %62 {offsets = [0, 96], sizes = [8, 32], strides = [1, 1]} : vector<8x128xf32> to vector<8x32xf32>
    %68 = arith.mulf %65, %30 : vector<8x32xf32>
    %69 = arith.mulf %64, %66 : vector<8x32xf32>
    %70 = arith.addf %68, %69 : vector<8x32xf32>
    %71 = math.tanh %70 : vector<8x32xf32>
    %72 = arith.mulf %67, %71 : vector<8x32xf32>
    %cst_27 = arith.constant dense<0.000000e+00> : vector<8x256xf32>
    %73 = tpu.matmul %72, %9, %cst_27 {dimension_numbers = #tpu.dot_dimension_numbers<[1], [0], [0], [1], [0, 0, 1, 1], [], []>} : vector<8x32xf32>, vector<32x256xf32>, vector<8x256xf32> -> vector<8x256xf32>
    %74 = vector.extract_strided_slice %73 {offsets = [0, 0], sizes = [8, 128], strides = [1, 1]} : vector<8x256xf32> to vector<8x128xf32>
    %cst_28 = arith.constant dense<0.000000e+00> : vector<8x128xf32>
    %75 = tpu.matmul %53, %10, %cst_28 {dimension_numbers = #tpu.dot_dimension_numbers<[1], [0], [0], [1], [0, 0, 1, 1], [], []>} : vector<8x32xf32>, vector<32x128xf32>, vector<8x128xf32> -> vector<8x128xf32>
    %76 = arith.addf %74, %75 : vector<8x128xf32>
    %77 = vector.broadcast %11 : vector<1x128xf32> to vector<8x128xf32>
    %78 = arith.addf %76, %77 : vector<8x128xf32>
    %79 = arith.negf %78 : vector<8x128xf32>
    %80 = math.exp %79 : vector<8x128xf32>
    %cst_29 = arith.constant 1.000000e+00 : f32
    %81 = vector.broadcast %cst_29 : f32 to vector<8x128xf32>
    %82 = arith.addf %81, %80 : vector<8x128xf32>
    %83 = arith.divf %81, %82 : vector<8x128xf32>
    %84 = math.tanh %78 : vector<8x128xf32>
    %85 = vector.extract_strided_slice %83 {offsets = [0, 0], sizes = [8, 32], strides = [1, 1]} : vector<8x128xf32> to vector<8x32xf32>
    %86 = vector.extract_strided_slice %83 {offsets = [0, 32], sizes = [8, 32], strides = [1, 1]} : vector<8x128xf32> to vector<8x32xf32>
    %87 = vector.extract_strided_slice %84 {offsets = [0, 64], sizes = [8, 32], strides = [1, 1]} : vector<8x128xf32> to vector<8x32xf32>
    %88 = vector.extract_strided_slice %83 {offsets = [0, 96], sizes = [8, 32], strides = [1, 1]} : vector<8x128xf32> to vector<8x32xf32>
    %89 = arith.mulf %86, %51 : vector<8x32xf32>
    %90 = arith.mulf %85, %87 : vector<8x32xf32>
    %91 = arith.addf %89, %90 : vector<8x32xf32>
    %92 = math.tanh %91 : vector<8x32xf32>
    %93 = arith.mulf %88, %92 : vector<8x32xf32>
    %94 = vector.extract_strided_slice %73 {offsets = [0, 128], sizes = [8, 128], strides = [1, 1]} : vector<8x256xf32> to vector<8x128xf32>
    %c8 = arith.constant 8 : index
    %c0_30 = arith.constant 0 : index
    %95 = vector.load %arg10[%c8, %c0_30] : memref<64x32xf32, #tpu.memory_space<vmem>>, vector<8x32xf32>
    tpu.vector_store %arg10[%c8, %c0_30], %93 {strides = array<i32>} : memref<64x32xf32, #tpu.memory_space<vmem>>, vector<8x32xf32>,
    %96 = vector.extract_strided_slice %8 {offsets = [16, 0], sizes = [8, 128], strides = [1, 1]} : vector<64x128xf32> to vector<8x128xf32>
    %97 = arith.addf %96, %94 : vector<8x128xf32>
    %98 = arith.negf %97 : vector<8x128xf32>
    %99 = math.exp %98 : vector<8x128xf32>
    %cst_31 = arith.constant 1.000000e+00 : f32
    %100 = vector.broadcast %cst_31 : f32 to vector<8x128xf32>
    %101 = arith.addf %100, %99 : vector<8x128xf32>
    %102 = arith.divf %100, %101 : vector<8x128xf32>
    %103 = math.tanh %97 : vector<8x128xf32>
    %104 = vector.extract_strided_slice %102 {offsets = [0, 0], sizes = [8, 32], strides = [1, 1]} : vector<8x128xf32> to vector<8x32xf32>
    %105 = vector.extract_strided_slice %102 {offsets = [0, 32], sizes = [8, 32], strides = [1, 1]} : vector<8x128xf32> to vector<8x32xf32>
    %106 = vector.extract_strided_slice %103 {offsets = [0, 64], sizes = [8, 32], strides = [1, 1]} : vector<8x128xf32> to vector<8x32xf32>
    %107 = vector.extract_strided_slice %102 {offsets = [0, 96], sizes = [8, 32], strides = [1, 1]} : vector<8x128xf32> to vector<8x32xf32>
    %108 = arith.mulf %105, %70 : vector<8x32xf32>
    %109 = arith.mulf %104, %106 : vector<8x32xf32>
    %110 = arith.addf %108, %109 : vector<8x32xf32>
    %111 = math.tanh %110 : vector<8x32xf32>
    %112 = arith.mulf %107, %111 : vector<8x32xf32>
    %cst_32 = arith.constant dense<0.000000e+00> : vector<8x256xf32>
    %113 = tpu.matmul %112, %9, %cst_32 {dimension_numbers = #tpu.dot_dimension_numbers<[1], [0], [0], [1], [0, 0, 1, 1], [], []>} : vector<8x32xf32>, vector<32x256xf32>, vector<8x256xf32> -> vector<8x256xf32>
    %114 = vector.extract_strided_slice %113 {offsets = [0, 0], sizes = [8, 128], strides = [1, 1]} : vector<8x256xf32> to vector<8x128xf32>
    %cst_33 = arith.constant dense<0.000000e+00> : vector<8x128xf32>
    %115 = tpu.matmul %93, %10, %cst_33 {dimension_numbers = #tpu.dot_dimension_numbers<[1], [0], [0], [1], [0, 0, 1, 1], [], []>} : vector<8x32xf32>, vector<32x128xf32>, vector<8x128xf32> -> vector<8x128xf32>
    %116 = arith.addf %114, %115 : vector<8x128xf32>
    %117 = vector.broadcast %11 : vector<1x128xf32> to vector<8x128xf32>
    %118 = arith.addf %116, %117 : vector<8x128xf32>
    %119 = arith.negf %118 : vector<8x128xf32>
    %120 = math.exp %119 : vector<8x128xf32>
    %cst_34 = arith.constant 1.000000e+00 : f32
    %121 = vector.broadcast %cst_34 : f32 to vector<8x128xf32>
    %122 = arith.addf %121, %120 : vector<8x128xf32>
    %123 = arith.divf %121, %122 : vector<8x128xf32>
    %124 = math.tanh %118 : vector<8x128xf32>
    %125 = vector.extract_strided_slice %123 {offsets = [0, 0], sizes = [8, 32], strides = [1, 1]} : vector<8x128xf32> to vector<8x32xf32>
    %126 = vector.extract_strided_slice %123 {offsets = [0, 32], sizes = [8, 32], strides = [1, 1]} : vector<8x128xf32> to vector<8x32xf32>
    %127 = vector.extract_strided_slice %124 {offsets = [0, 64], sizes = [8, 32], strides = [1, 1]} : vector<8x128xf32> to vector<8x32xf32>
    %128 = vector.extract_strided_slice %123 {offsets = [0, 96], sizes = [8, 32], strides = [1, 1]} : vector<8x128xf32> to vector<8x32xf32>
    %129 = arith.mulf %126, %91 : vector<8x32xf32>
    %130 = arith.mulf %125, %127 : vector<8x32xf32>
    %131 = arith.addf %129, %130 : vector<8x32xf32>
    %132 = math.tanh %131 : vector<8x32xf32>
    %133 = arith.mulf %128, %132 : vector<8x32xf32>
    %134 = vector.extract_strided_slice %113 {offsets = [0, 128], sizes = [8, 128], strides = [1, 1]} : vector<8x256xf32> to vector<8x128xf32>
    %c16 = arith.constant 16 : index
    %c0_35 = arith.constant 0 : index
    %135 = vector.load %arg10[%c16, %c0_35] : memref<64x32xf32, #tpu.memory_space<vmem>>, vector<8x32xf32>
    tpu.vector_store %arg10[%c16, %c0_35], %133 {strides = array<i32>} : memref<64x32xf32, #tpu.memory_space<vmem>>, vector<8x32xf32>,
    %136 = vector.extract_strided_slice %8 {offsets = [24, 0], sizes = [8, 128], strides = [1, 1]} : vector<64x128xf32> to vector<8x128xf32>
    %137 = arith.addf %136, %134 : vector<8x128xf32>
    %138 = arith.negf %137 : vector<8x128xf32>
    %139 = math.exp %138 : vector<8x128xf32>
    %cst_36 = arith.constant 1.000000e+00 : f32
    %140 = vector.broadcast %cst_36 : f32 to vector<8x128xf32>
    %141 = arith.addf %140, %139 : vector<8x128xf32>
    %142 = arith.divf %140, %141 : vector<8x128xf32>
    %143 = math.tanh %137 : vector<8x128xf32>
    %144 = vector.extract_strided_slice %142 {offsets = [0, 0], sizes = [8, 32], strides = [1, 1]} : vector<8x128xf32> to vector<8x32xf32>
    %145 = vector.extract_strided_slice %142 {offsets = [0, 32], sizes = [8, 32], strides = [1, 1]} : vector<8x128xf32> to vector<8x32xf32>
    %146 = vector.extract_strided_slice %143 {offsets = [0, 64], sizes = [8, 32], strides = [1, 1]} : vector<8x128xf32> to vector<8x32xf32>
    %147 = vector.extract_strided_slice %142 {offsets = [0, 96], sizes = [8, 32], strides = [1, 1]} : vector<8x128xf32> to vector<8x32xf32>
    %148 = arith.mulf %145, %110 : vector<8x32xf32>
    %149 = arith.mulf %144, %146 : vector<8x32xf32>
    %150 = arith.addf %148, %149 : vector<8x32xf32>
    %151 = math.tanh %150 : vector<8x32xf32>
    %152 = arith.mulf %147, %151 : vector<8x32xf32>
    %cst_37 = arith.constant dense<0.000000e+00> : vector<8x256xf32>
    %153 = tpu.matmul %152, %9, %cst_37 {dimension_numbers = #tpu.dot_dimension_numbers<[1], [0], [0], [1], [0, 0, 1, 1], [], []>} : vector<8x32xf32>, vector<32x256xf32>, vector<8x256xf32> -> vector<8x256xf32>
    %154 = vector.extract_strided_slice %153 {offsets = [0, 0], sizes = [8, 128], strides = [1, 1]} : vector<8x256xf32> to vector<8x128xf32>
    %cst_38 = arith.constant dense<0.000000e+00> : vector<8x128xf32>
    %155 = tpu.matmul %133, %10, %cst_38 {dimension_numbers = #tpu.dot_dimension_numbers<[1], [0], [0], [1], [0, 0, 1, 1], [], []>} : vector<8x32xf32>, vector<32x128xf32>, vector<8x128xf32> -> vector<8x128xf32>
    %156 = arith.addf %154, %155 : vector<8x128xf32>
    %157 = vector.broadcast %11 : vector<1x128xf32> to vector<8x128xf32>
    %158 = arith.addf %156, %157 : vector<8x128xf32>
    %159 = arith.negf %158 : vector<8x128xf32>
    %160 = math.exp %159 : vector<8x128xf32>
    %cst_39 = arith.constant 1.000000e+00 : f32
    %161 = vector.broadcast %cst_39 : f32 to vector<8x128xf32>
    %162 = arith.addf %161, %160 : vector<8x128xf32>
    %163 = arith.divf %161, %162 : vector<8x128xf32>
    %164 = math.tanh %158 : vector<8x128xf32>
    %165 = vector.extract_strided_slice %163 {offsets = [0, 0], sizes = [8, 32], strides = [1, 1]} : vector<8x128xf32> to vector<8x32xf32>
    %166 = vector.extract_strided_slice %163 {offsets = [0, 32], sizes = [8, 32], strides = [1, 1]} : vector<8x128xf32> to vector<8x32xf32>
    %167 = vector.extract_strided_slice %164 {offsets = [0, 64], sizes = [8, 32], strides = [1, 1]} : vector<8x128xf32> to vector<8x32xf32>
    %168 = vector.extract_strided_slice %163 {offsets = [0, 96], sizes = [8, 32], strides = [1, 1]} : vector<8x128xf32> to vector<8x32xf32>
    %169 = arith.mulf %166, %131 : vector<8x32xf32>
    %170 = arith.mulf %165, %167 : vector<8x32xf32>
    %171 = arith.addf %169, %170 : vector<8x32xf32>
    %172 = math.tanh %171 : vector<8x32xf32>
    %173 = arith.mulf %168, %172 : vector<8x32xf32>
    %174 = vector.extract_strided_slice %153 {offsets = [0, 128], sizes = [8, 128], strides = [1, 1]} : vector<8x256xf32> to vector<8x128xf32>
    %c24 = arith.constant 24 : index
    %c0_40 = arith.constant 0 : index
    %175 = vector.load %arg10[%c24, %c0_40] : memref<64x32xf32, #tpu.memory_space<vmem>>, vector<8x32xf32>
    tpu.vector_store %arg10[%c24, %c0_40], %173 {strides = array<i32>} : memref<64x32xf32, #tpu.memory_space<vmem>>, vector<8x32xf32>,
    %176 = vector.extract_strided_slice %8 {offsets = [32, 0], sizes = [8, 128], strides = [1, 1]} : vector<64x128xf32> to vector<8x128xf32>
    %177 = arith.addf %176, %174 : vector<8x128xf32>
    %178 = arith.negf %177 : vector<8x128xf32>
    %179 = math.exp %178 : vector<8x128xf32>
    %cst_41 = arith.constant 1.000000e+00 : f32
    %180 = vector.broadcast %cst_41 : f32 to vector<8x128xf32>
    %181 = arith.addf %180, %179 : vector<8x128xf32>
    %182 = arith.divf %180, %181 : vector<8x128xf32>
    %183 = math.tanh %177 : vector<8x128xf32>
    %184 = vector.extract_strided_slice %182 {offsets = [0, 0], sizes = [8, 32], strides = [1, 1]} : vector<8x128xf32> to vector<8x32xf32>
    %185 = vector.extract_strided_slice %182 {offsets = [0, 32], sizes = [8, 32], strides = [1, 1]} : vector<8x128xf32> to vector<8x32xf32>
    %186 = vector.extract_strided_slice %183 {offsets = [0, 64], sizes = [8, 32], strides = [1, 1]} : vector<8x128xf32> to vector<8x32xf32>
    %187 = vector.extract_strided_slice %182 {offsets = [0, 96], sizes = [8, 32], strides = [1, 1]} : vector<8x128xf32> to vector<8x32xf32>
    %188 = arith.mulf %185, %150 : vector<8x32xf32>
    %189 = arith.mulf %184, %186 : vector<8x32xf32>
    %190 = arith.addf %188, %189 : vector<8x32xf32>
    %191 = math.tanh %190 : vector<8x32xf32>
    %192 = arith.mulf %187, %191 : vector<8x32xf32>
    %cst_42 = arith.constant dense<0.000000e+00> : vector<8x256xf32>
    %193 = tpu.matmul %192, %9, %cst_42 {dimension_numbers = #tpu.dot_dimension_numbers<[1], [0], [0], [1], [0, 0, 1, 1], [], []>} : vector<8x32xf32>, vector<32x256xf32>, vector<8x256xf32> -> vector<8x256xf32>
    %194 = vector.extract_strided_slice %193 {offsets = [0, 0], sizes = [8, 128], strides = [1, 1]} : vector<8x256xf32> to vector<8x128xf32>
    %cst_43 = arith.constant dense<0.000000e+00> : vector<8x128xf32>
    %195 = tpu.matmul %173, %10, %cst_43 {dimension_numbers = #tpu.dot_dimension_numbers<[1], [0], [0], [1], [0, 0, 1, 1], [], []>} : vector<8x32xf32>, vector<32x128xf32>, vector<8x128xf32> -> vector<8x128xf32>
    %196 = arith.addf %194, %195 : vector<8x128xf32>
    %197 = vector.broadcast %11 : vector<1x128xf32> to vector<8x128xf32>
    %198 = arith.addf %196, %197 : vector<8x128xf32>
    %199 = arith.negf %198 : vector<8x128xf32>
    %200 = math.exp %199 : vector<8x128xf32>
    %cst_44 = arith.constant 1.000000e+00 : f32
    %201 = vector.broadcast %cst_44 : f32 to vector<8x128xf32>
    %202 = arith.addf %201, %200 : vector<8x128xf32>
    %203 = arith.divf %201, %202 : vector<8x128xf32>
    %204 = math.tanh %198 : vector<8x128xf32>
    %205 = vector.extract_strided_slice %203 {offsets = [0, 0], sizes = [8, 32], strides = [1, 1]} : vector<8x128xf32> to vector<8x32xf32>
    %206 = vector.extract_strided_slice %203 {offsets = [0, 32], sizes = [8, 32], strides = [1, 1]} : vector<8x128xf32> to vector<8x32xf32>
    %207 = vector.extract_strided_slice %204 {offsets = [0, 64], sizes = [8, 32], strides = [1, 1]} : vector<8x128xf32> to vector<8x32xf32>
    %208 = vector.extract_strided_slice %203 {offsets = [0, 96], sizes = [8, 32], strides = [1, 1]} : vector<8x128xf32> to vector<8x32xf32>
    %209 = arith.mulf %206, %171 : vector<8x32xf32>
    %210 = arith.mulf %205, %207 : vector<8x32xf32>
    %211 = arith.addf %209, %210 : vector<8x32xf32>
    %212 = math.tanh %211 : vector<8x32xf32>
    %213 = arith.mulf %208, %212 : vector<8x32xf32>
    %214 = vector.extract_strided_slice %193 {offsets = [0, 128], sizes = [8, 128], strides = [1, 1]} : vector<8x256xf32> to vector<8x128xf32>
    %c32 = arith.constant 32 : index
    %c0_45 = arith.constant 0 : index
    %215 = vector.load %arg10[%c32, %c0_45] : memref<64x32xf32, #tpu.memory_space<vmem>>, vector<8x32xf32>
    tpu.vector_store %arg10[%c32, %c0_45], %213 {strides = array<i32>} : memref<64x32xf32, #tpu.memory_space<vmem>>, vector<8x32xf32>,
    %216 = vector.extract_strided_slice %8 {offsets = [40, 0], sizes = [8, 128], strides = [1, 1]} : vector<64x128xf32> to vector<8x128xf32>
    %217 = arith.addf %216, %214 : vector<8x128xf32>
    %218 = arith.negf %217 : vector<8x128xf32>
    %219 = math.exp %218 : vector<8x128xf32>
    %cst_46 = arith.constant 1.000000e+00 : f32
    %220 = vector.broadcast %cst_46 : f32 to vector<8x128xf32>
    %221 = arith.addf %220, %219 : vector<8x128xf32>
    %222 = arith.divf %220, %221 : vector<8x128xf32>
    %223 = math.tanh %217 : vector<8x128xf32>
    %224 = vector.extract_strided_slice %222 {offsets = [0, 0], sizes = [8, 32], strides = [1, 1]} : vector<8x128xf32> to vector<8x32xf32>
    %225 = vector.extract_strided_slice %222 {offsets = [0, 32], sizes = [8, 32], strides = [1, 1]} : vector<8x128xf32> to vector<8x32xf32>
    %226 = vector.extract_strided_slice %223 {offsets = [0, 64], sizes = [8, 32], strides = [1, 1]} : vector<8x128xf32> to vector<8x32xf32>
    %227 = vector.extract_strided_slice %222 {offsets = [0, 96], sizes = [8, 32], strides = [1, 1]} : vector<8x128xf32> to vector<8x32xf32>
    %228 = arith.mulf %225, %190 : vector<8x32xf32>
    %229 = arith.mulf %224, %226 : vector<8x32xf32>
    %230 = arith.addf %228, %229 : vector<8x32xf32>
    %231 = math.tanh %230 : vector<8x32xf32>
    %232 = arith.mulf %227, %231 : vector<8x32xf32>
    %cst_47 = arith.constant dense<0.000000e+00> : vector<8x256xf32>
    %233 = tpu.matmul %232, %9, %cst_47 {dimension_numbers = #tpu.dot_dimension_numbers<[1], [0], [0], [1], [0, 0, 1, 1], [], []>} : vector<8x32xf32>, vector<32x256xf32>, vector<8x256xf32> -> vector<8x256xf32>
    %234 = vector.extract_strided_slice %233 {offsets = [0, 0], sizes = [8, 128], strides = [1, 1]} : vector<8x256xf32> to vector<8x128xf32>
    %cst_48 = arith.constant dense<0.000000e+00> : vector<8x128xf32>
    %235 = tpu.matmul %213, %10, %cst_48 {dimension_numbers = #tpu.dot_dimension_numbers<[1], [0], [0], [1], [0, 0, 1, 1], [], []>} : vector<8x32xf32>, vector<32x128xf32>, vector<8x128xf32> -> vector<8x128xf32>
    %236 = arith.addf %234, %235 : vector<8x128xf32>
    %237 = vector.broadcast %11 : vector<1x128xf32> to vector<8x128xf32>
    %238 = arith.addf %236, %237 : vector<8x128xf32>
    %239 = arith.negf %238 : vector<8x128xf32>
    %240 = math.exp %239 : vector<8x128xf32>
    %cst_49 = arith.constant 1.000000e+00 : f32
    %241 = vector.broadcast %cst_49 : f32 to vector<8x128xf32>
    %242 = arith.addf %241, %240 : vector<8x128xf32>
    %243 = arith.divf %241, %242 : vector<8x128xf32>
    %244 = math.tanh %238 : vector<8x128xf32>
    %245 = vector.extract_strided_slice %243 {offsets = [0, 0], sizes = [8, 32], strides = [1, 1]} : vector<8x128xf32> to vector<8x32xf32>
    %246 = vector.extract_strided_slice %243 {offsets = [0, 32], sizes = [8, 32], strides = [1, 1]} : vector<8x128xf32> to vector<8x32xf32>
    %247 = vector.extract_strided_slice %244 {offsets = [0, 64], sizes = [8, 32], strides = [1, 1]} : vector<8x128xf32> to vector<8x32xf32>
    %248 = vector.extract_strided_slice %243 {offsets = [0, 96], sizes = [8, 32], strides = [1, 1]} : vector<8x128xf32> to vector<8x32xf32>
    %249 = arith.mulf %246, %211 : vector<8x32xf32>
    %250 = arith.mulf %245, %247 : vector<8x32xf32>
    %251 = arith.addf %249, %250 : vector<8x32xf32>
    %252 = math.tanh %251 : vector<8x32xf32>
    %253 = arith.mulf %248, %252 : vector<8x32xf32>
    %254 = vector.extract_strided_slice %233 {offsets = [0, 128], sizes = [8, 128], strides = [1, 1]} : vector<8x256xf32> to vector<8x128xf32>
    %c40 = arith.constant 40 : index
    %c0_50 = arith.constant 0 : index
    %255 = vector.load %arg10[%c40, %c0_50] : memref<64x32xf32, #tpu.memory_space<vmem>>, vector<8x32xf32>
    tpu.vector_store %arg10[%c40, %c0_50], %253 {strides = array<i32>} : memref<64x32xf32, #tpu.memory_space<vmem>>, vector<8x32xf32>,
    %256 = vector.extract_strided_slice %8 {offsets = [48, 0], sizes = [8, 128], strides = [1, 1]} : vector<64x128xf32> to vector<8x128xf32>
    %257 = arith.addf %256, %254 : vector<8x128xf32>
    %258 = arith.negf %257 : vector<8x128xf32>
    %259 = math.exp %258 : vector<8x128xf32>
    %cst_51 = arith.constant 1.000000e+00 : f32
    %260 = vector.broadcast %cst_51 : f32 to vector<8x128xf32>
    %261 = arith.addf %260, %259 : vector<8x128xf32>
    %262 = arith.divf %260, %261 : vector<8x128xf32>
    %263 = math.tanh %257 : vector<8x128xf32>
    %264 = vector.extract_strided_slice %262 {offsets = [0, 0], sizes = [8, 32], strides = [1, 1]} : vector<8x128xf32> to vector<8x32xf32>
    %265 = vector.extract_strided_slice %262 {offsets = [0, 32], sizes = [8, 32], strides = [1, 1]} : vector<8x128xf32> to vector<8x32xf32>
    %266 = vector.extract_strided_slice %263 {offsets = [0, 64], sizes = [8, 32], strides = [1, 1]} : vector<8x128xf32> to vector<8x32xf32>
    %267 = vector.extract_strided_slice %262 {offsets = [0, 96], sizes = [8, 32], strides = [1, 1]} : vector<8x128xf32> to vector<8x32xf32>
    %268 = arith.mulf %265, %230 : vector<8x32xf32>
    %269 = arith.mulf %264, %266 : vector<8x32xf32>
    %270 = arith.addf %268, %269 : vector<8x32xf32>
    %271 = math.tanh %270 : vector<8x32xf32>
    %272 = arith.mulf %267, %271 : vector<8x32xf32>
    %cst_52 = arith.constant dense<0.000000e+00> : vector<8x256xf32>
    %273 = tpu.matmul %272, %9, %cst_52 {dimension_numbers = #tpu.dot_dimension_numbers<[1], [0], [0], [1], [0, 0, 1, 1], [], []>} : vector<8x32xf32>, vector<32x256xf32>, vector<8x256xf32> -> vector<8x256xf32>
    %274 = vector.extract_strided_slice %273 {offsets = [0, 0], sizes = [8, 128], strides = [1, 1]} : vector<8x256xf32> to vector<8x128xf32>
    %cst_53 = arith.constant dense<0.000000e+00> : vector<8x128xf32>
    %275 = tpu.matmul %253, %10, %cst_53 {dimension_numbers = #tpu.dot_dimension_numbers<[1], [0], [0], [1], [0, 0, 1, 1], [], []>} : vector<8x32xf32>, vector<32x128xf32>, vector<8x128xf32> -> vector<8x128xf32>
    %276 = arith.addf %274, %275 : vector<8x128xf32>
    %277 = vector.broadcast %11 : vector<1x128xf32> to vector<8x128xf32>
    %278 = arith.addf %276, %277 : vector<8x128xf32>
    %279 = arith.negf %278 : vector<8x128xf32>
    %280 = math.exp %279 : vector<8x128xf32>
    %cst_54 = arith.constant 1.000000e+00 : f32
    %281 = vector.broadcast %cst_54 : f32 to vector<8x128xf32>
    %282 = arith.addf %281, %280 : vector<8x128xf32>
    %283 = arith.divf %281, %282 : vector<8x128xf32>
    %284 = math.tanh %278 : vector<8x128xf32>
    %285 = vector.extract_strided_slice %283 {offsets = [0, 0], sizes = [8, 32], strides = [1, 1]} : vector<8x128xf32> to vector<8x32xf32>
    %286 = vector.extract_strided_slice %283 {offsets = [0, 32], sizes = [8, 32], strides = [1, 1]} : vector<8x128xf32> to vector<8x32xf32>
    %287 = vector.extract_strided_slice %284 {offsets = [0, 64], sizes = [8, 32], strides = [1, 1]} : vector<8x128xf32> to vector<8x32xf32>
    %288 = vector.extract_strided_slice %283 {offsets = [0, 96], sizes = [8, 32], strides = [1, 1]} : vector<8x128xf32> to vector<8x32xf32>
    %289 = arith.mulf %286, %251 : vector<8x32xf32>
    %290 = arith.mulf %285, %287 : vector<8x32xf32>
    %291 = arith.addf %289, %290 : vector<8x32xf32>
    %292 = math.tanh %291 : vector<8x32xf32>
    %293 = arith.mulf %288, %292 : vector<8x32xf32>
    %294 = vector.extract_strided_slice %273 {offsets = [0, 128], sizes = [8, 128], strides = [1, 1]} : vector<8x256xf32> to vector<8x128xf32>
    %c48 = arith.constant 48 : index
    %c0_55 = arith.constant 0 : index
    %295 = vector.load %arg10[%c48, %c0_55] : memref<64x32xf32, #tpu.memory_space<vmem>>, vector<8x32xf32>
    tpu.vector_store %arg10[%c48, %c0_55], %293 {strides = array<i32>} : memref<64x32xf32, #tpu.memory_space<vmem>>, vector<8x32xf32>,
    %296 = vector.extract_strided_slice %8 {offsets = [56, 0], sizes = [8, 128], strides = [1, 1]} : vector<64x128xf32> to vector<8x128xf32>
    %297 = arith.addf %296, %294 : vector<8x128xf32>
    %298 = arith.negf %297 : vector<8x128xf32>
    %299 = math.exp %298 : vector<8x128xf32>
    %cst_56 = arith.constant 1.000000e+00 : f32
    %300 = vector.broadcast %cst_56 : f32 to vector<8x128xf32>
    %301 = arith.addf %300, %299 : vector<8x128xf32>
    %302 = arith.divf %300, %301 : vector<8x128xf32>
    %303 = math.tanh %297 : vector<8x128xf32>
    %304 = vector.extract_strided_slice %302 {offsets = [0, 0], sizes = [8, 32], strides = [1, 1]} : vector<8x128xf32> to vector<8x32xf32>
    %305 = vector.extract_strided_slice %302 {offsets = [0, 32], sizes = [8, 32], strides = [1, 1]} : vector<8x128xf32> to vector<8x32xf32>
    %306 = vector.extract_strided_slice %303 {offsets = [0, 64], sizes = [8, 32], strides = [1, 1]} : vector<8x128xf32> to vector<8x32xf32>
    %307 = vector.extract_strided_slice %302 {offsets = [0, 96], sizes = [8, 32], strides = [1, 1]} : vector<8x128xf32> to vector<8x32xf32>
    %308 = arith.mulf %305, %270 : vector<8x32xf32>
    %309 = arith.mulf %304, %306 : vector<8x32xf32>
    %310 = arith.addf %308, %309 : vector<8x32xf32>
    %311 = math.tanh %310 : vector<8x32xf32>
    %312 = arith.mulf %307, %311 : vector<8x32xf32>
    %cst_57 = arith.constant dense<0.000000e+00> : vector<8x256xf32>
    %313 = tpu.matmul %312, %9, %cst_57 {dimension_numbers = #tpu.dot_dimension_numbers<[1], [0], [0], [1], [0, 0, 1, 1], [], []>} : vector<8x32xf32>, vector<32x256xf32>, vector<8x256xf32> -> vector<8x256xf32>
    %314 = vector.extract_strided_slice %313 {offsets = [0, 0], sizes = [8, 128], strides = [1, 1]} : vector<8x256xf32> to vector<8x128xf32>
    %cst_58 = arith.constant dense<0.000000e+00> : vector<8x128xf32>
    %315 = tpu.matmul %293, %10, %cst_58 {dimension_numbers = #tpu.dot_dimension_numbers<[1], [0], [0], [1], [0, 0, 1, 1], [], []>} : vector<8x32xf32>, vector<32x128xf32>, vector<8x128xf32> -> vector<8x128xf32>
    %316 = arith.addf %314, %315 : vector<8x128xf32>
    %317 = vector.broadcast %11 : vector<1x128xf32> to vector<8x128xf32>
    %318 = arith.addf %316, %317 : vector<8x128xf32>
    %319 = arith.negf %318 : vector<8x128xf32>
    %320 = math.exp %319 : vector<8x128xf32>
    %cst_59 = arith.constant 1.000000e+00 : f32
    %321 = vector.broadcast %cst_59 : f32 to vector<8x128xf32>
    %322 = arith.addf %321, %320 : vector<8x128xf32>
    %323 = arith.divf %321, %322 : vector<8x128xf32>
    %324 = math.tanh %318 : vector<8x128xf32>
    %325 = vector.extract_strided_slice %323 {offsets = [0, 0], sizes = [8, 32], strides = [1, 1]} : vector<8x128xf32> to vector<8x32xf32>
    %326 = vector.extract_strided_slice %323 {offsets = [0, 32], sizes = [8, 32], strides = [1, 1]} : vector<8x128xf32> to vector<8x32xf32>
    %327 = vector.extract_strided_slice %324 {offsets = [0, 64], sizes = [8, 32], strides = [1, 1]} : vector<8x128xf32> to vector<8x32xf32>
    %328 = vector.extract_strided_slice %323 {offsets = [0, 96], sizes = [8, 32], strides = [1, 1]} : vector<8x128xf32> to vector<8x32xf32>
    %329 = arith.mulf %326, %291 : vector<8x32xf32>
    %330 = arith.mulf %325, %327 : vector<8x32xf32>
    %331 = arith.addf %329, %330 : vector<8x32xf32>
    %332 = math.tanh %331 : vector<8x32xf32>
    %333 = arith.mulf %328, %332 : vector<8x32xf32>
    %334 = vector.extract_strided_slice %313 {offsets = [0, 128], sizes = [8, 128], strides = [1, 1]} : vector<8x256xf32> to vector<8x128xf32>
    %c56 = arith.constant 56 : index
    %c0_60 = arith.constant 0 : index
    %335 = vector.load %arg10[%c56, %c0_60] : memref<64x32xf32, #tpu.memory_space<vmem>>, vector<8x32xf32>
    tpu.vector_store %arg10[%c56, %c0_60], %333 {strides = array<i32>} : memref<64x32xf32, #tpu.memory_space<vmem>>, vector<8x32xf32>,
    %c0_61 = arith.constant 0 : index
    %c0_62 = arith.constant 0 : index
    %336 = vector.load %arg11[%c0_61, %c0_62] : memref<8x128xf32, #tpu.memory_space<vmem>>, vector<8x128xf32>
    tpu.vector_store %arg11[%c0_61, %c0_62], %334 {strides = array<i32>} : memref<8x128xf32, #tpu.memory_space<vmem>>, vector<8x128xf32>,
    %c0_63 = arith.constant 0 : index
    %c0_64 = arith.constant 0 : index
    %337 = vector.load %arg12[%c0_63, %c0_64] : memref<8x32xf32, #tpu.memory_space<vmem>>, vector<8x32xf32>
    tpu.vector_store %arg12[%c0_63, %c0_64], %310 {strides = array<i32>} : memref<8x32xf32, #tpu.memory_space<vmem>>, vector<8x32xf32>,
    %c0_65 = arith.constant 0 : index
    %c0_66 = arith.constant 0 : index
    %338 = vector.load %arg13[%c0_65, %c0_66] : memref<8x32xf32, #tpu.memory_space<vmem>>, vector<8x32xf32>
    tpu.vector_store %arg13[%c0_65, %c0_66], %333 {strides = array<i32>} : memref<8x32xf32, #tpu.memory_space<vmem>>, vector<8x32xf32>,
    %c0_67 = arith.constant 0 : index
    %c0_68 = arith.constant 0 : index
    %339 = vector.load %arg14[%c0_67, %c0_68] : memref<8x32xf32, #tpu.memory_space<vmem>>, vector<8x32xf32>
    tpu.vector_store %arg14[%c0_67, %c0_68], %331 {strides = array<i32>} : memref<8x32xf32, #tpu.memory_space<vmem>>, vector<8x32xf32>,
    %c0_69 = arith.constant 0 : index
    %c0_70 = arith.constant 0 : index
    %340 = vector.load %arg10[%c0_69, %c0_70] : memref<64x32xf32, #tpu.memory_space<vmem>>, vector<64x32xf32>
    %c0_71 = arith.constant 0 : index
    %c0_72 = arith.constant 0 : index
    %341 = vector.load %arg7[%c0_71, %c0_72] : memref<32x128xf32, #tpu.memory_space<vmem>>, vector<32x128xf32>
    %cst_73 = arith.constant dense<0.000000e+00> : vector<64x128xf32>
    %342 = tpu.matmul %340, %341, %cst_73 {dimension_numbers = #tpu.dot_dimension_numbers<[1], [0], [0], [1], [0, 0, 1, 1], [], []>} : vector<64x32xf32>, vector<32x128xf32>, vector<64x128xf32> -> vector<64x128xf32>
    %c0_74 = arith.constant 0 : index
    %c0_75 = arith.constant 0 : index
    %343 = vector.load %arg8[%c0_74, %c0_75] : memref<1x128xf32, #tpu.memory_space<vmem>>, vector<1x128xf32>
    %344 = vector.broadcast %343 : vector<1x128xf32> to vector<64x128xf32>
    %345 = arith.addf %342, %344 : vector<64x128xf32>
    %c0_76 = arith.constant 0 : index
    %c0_77 = arith.constant 0 : index
    %346 = vector.load %arg9[%c0_76, %c0_77] : memref<64x128xf32, #tpu.memory_space<vmem>>, vector<64x128xf32>
    tpu.vector_store %arg9[%c0_76, %c0_77], %345 {strides = array<i32>} : memref<64x128xf32, #tpu.memory_space<vmem>>, vector<64x128xf32>,
    return
  }
  func.func @transform_0(%arg0: i32) -> (i32, i32) {
    %c0_i32 = arith.constant 0 : i32
    %c0_i32_0 = arith.constant 0 : i32
    return %arg0, %c0_i32 : i32, i32
  }
  func.func @transform_1(%arg0: i32) -> (i32, i32) {
    %c0_i32 = arith.constant 0 : i32
    %c0_i32_0 = arith.constant 0 : i32
    %c0_i32_1 = arith.constant 0 : i32
    return %c0_i32, %c0_i32_0 : i32, i32
  }
  func.func @transform_2(%arg0: i32) -> (i32, i32) {
    %c0_i32 = arith.constant 0 : i32
    %c0_i32_0 = arith.constant 0 : i32
    %c0_i32_1 = arith.constant 0 : i32
    return %c0_i32, %c0_i32_0 : i32, i32
  }
  func.func @transform_3(%arg0: i32) -> (i32, i32) {
    %c0_i32 = arith.constant 0 : i32
    %c0_i32_0 = arith.constant 0 : i32
    %c0_i32_1 = arith.constant 0 : i32
    return %c0_i32, %c0_i32_0 : i32, i32
  }
  func.func @transform_4(%arg0: i32) -> (i32, i32) {
    %c0_i32 = arith.constant 0 : i32
    %c0_i32_0 = arith.constant 0 : i32
    %c0_i32_1 = arith.constant 0 : i32
    return %c0_i32, %c0_i32_0 : i32, i32
  }
  func.func @transform_5(%arg0: i32) -> (i32, i32) {
    %c0_i32 = arith.constant 0 : i32
    %c0_i32_0 = arith.constant 0 : i32
    %c0_i32_1 = arith.constant 0 : i32
    return %c0_i32, %c0_i32_0 : i32, i32
  }
  func.func @transform_6(%arg0: i32) -> (i32, i32) {
    %c0_i32 = arith.constant 0 : i32
    %c0_i32_0 = arith.constant 0 : i32
    %c0_i32_1 = arith.constant 0 : i32
    return %c0_i32, %c0_i32_0 : i32, i32
  }
  func.func @transform_7(%arg0: i32) -> (i32, i32) {
    %c0_i32 = arith.constant 0 : i32
    %c0_i32_0 = arith.constant 0 : i32
    %c0_i32_1 = arith.constant 0 : i32
    return %c0_i32, %c0_i32_0 : i32, i32
  }
  func.func @transform_8(%arg0: i32) -> (i32, i32) {
    %c0_i32 = arith.constant 0 : i32
    %c0_i32_0 = arith.constant 0 : i32
    return %arg0, %c0_i32 : i32, i32
  }
}

</mosaic_0001>

<bundles_post_ra>
// kernel: tpu_custom_call.1
= control target key start
LH: loop header
LB: loop body
LE: loop exit
PB: predicated region body
PF: predicated region fallthrough
CT: control target
= control target key end

     0   :  { %13 = vsyncpa [#allocation8], 0  ;;  %s3093_s0 = inlined_call_operand.vmem [shape: f32[64,8], index: 0, kind: input, shape index: {}]   ;;  %s3094_s1 = inlined_call_operand.vmem [shape: f32[8,128], index: 1, kind: input, shape index: {}]   ;;  %s3095_s2 = inlined_call_operand.vmem [shape: f32[32,256], index: 2, kind: input, shape index: {}]   ;;  %s3096_s3 = inlined_call_operand.hbm [shape: f32[32,128], index: 3, kind: input, shape index: {}]   ;;  %s3097_s4 = inlined_call_operand.vmem [shape: f32[1,128], index: 4, kind: input, shape index: {}]   ;;  %s3098_s5 = inlined_call_operand.vmem [shape: f32[1,128], index: 5, kind: input, shape index: {}]   ;;  %s3099_s6 = inlined_call_operand.hbm [shape: f32[32,128], index: 6, kind: input, shape index: {}]   ;;  %s3100_s7 = inlined_call_operand.vmem [shape: f32[1,128], index: 7, kind: input, shape index: {}]   ;;  %s3101_s8 = inlined_call_operand.hbm [shape: f32[64,128], index: 8, kind: output, shape index: {}]  }
   0x1   :  { %14 = vsyncpa [#allocation11], 0 }
   0x2   :  { %15 = vsyncpa [#allocation9], 0  ;;  %s2631_s27 = smov [#allocation7]   ;;  %s2559_s9 = scalar_lea.hbm %s3096_s3, 512 }
   0x3   :  { %s27_s28 = sshll.u32 %s2631_s27, 4  ;;  %p2560_p0 = scmp.ne.s32.totalorder %s3096_s3, %s2559_s9  ;;  %s28_s28 = int_to_ptr.vmem [resolvable:$true] %s27_s28 }
   0x4   :  { %p2563_p1 = scmp.lt.u32.totalorder %s2559_s9, %s3096_s3 }
   0x6   :  { %p2565_p2 = pnand %p2563_p1, %p2560_p0 }
   0x8   :  { %2568 = shalt.err (!%p2565_p2)
}
   0x9   :  { %s2569_s14 = scalar_lea.vmem %s28_s28, 512  ;;  %p2574_p4 = scmp.lt.s32.totalorder %s28_s28, %s28_s28 }
   0xa   :  { %p2570_p3 = scmp.ne.s32.totalorder %s28_s28, %s2569_s14  ;;  %p2575_p5 = scmp.lt.s32.totalorder %s2569_s14, %s2569_s14 }
   0xc   :  { %p2576_p6 = por %p2575_p5, %p2574_p4 }
   0xe   :  { %p2577_p7 = pnand %p2576_p6, %p2570_p3 }
  0x10   :  { %2580 = shalt.err (!%p2577_p7)
}
  0x11   :  { %s2632_s15 = smov 128   ;;  %s2633_s16 = smov 8  }
  0x12   :  { %33 = dma.hbm_to_vmem [thread:$0]  %s3096_s3, 512, %s28_s28, [#allocation8], %s2632_s15, %s2632_s15, %s2633_s16  }
  0x13   :  { %s2634_s19 = smov [#allocation10]   ;;  %s2581_s23 = scalar_lea.hbm %s3099_s6, 512 }
  0x14   :  { %s43_s20 = sshll.u32 %s2634_s19, 4  ;;  %p2582_p8 = scmp.ne.s32.totalorder %s3099_s6, %s2581_s23  ;;  %s44_s20 = int_to_ptr.vmem [resolvable:$true] %s43_s20 }
  0x15   :  { %p2585_p9 = scmp.lt.u32.totalorder %s2581_s23, %s3099_s6 }
  0x17   :  { %p2587_p10 = pnand %p2585_p9, %p2582_p8 }
  0x19   :  { %2590 = shalt.err (!%p2587_p10)
}
  0x1a   :  { %s2591_s29 = scalar_lea.vmem %s44_s20, 512  ;;  %p2596_p12 = scmp.lt.s32.totalorder %s44_s20, %s44_s20 }
  0x1b   :  { %p2592_p11 = scmp.ne.s32.totalorder %s44_s20, %s2591_s29  ;;  %p2597_p13 = scmp.lt.s32.totalorder %s2591_s29, %s2591_s29 }
  0x1d   :  { %p2598_p0 = por %p2597_p13, %p2596_p12 }
  0x1f   :  { %p2599_p1 = pnand %p2598_p0, %p2592_p11 }
  0x21   :  { %2602 = shalt.err (!%p2599_p1)
}
  0x22   :  { %49 = dma.hbm_to_vmem [thread:$0]  %s3099_s6, 512, %s44_s20, [#allocation11], %s2632_s15, %s2632_s15, %s2633_s16  }
  0x23   :  { %2625 = dma.done.wait [#allocation8], 512  }
  0x24   :  { %2626 = vsyncadd [#allocation8], 4294966784 }
  0x25   :  { %2627 = dma.done.wait [#allocation11], 512  }
  0x26   :  { %2628 = vsyncadd [#allocation11], 4294966784  ;;  %vm83_vm0 = vcmask 64512   ;;  %v75_v0 = vld [vmem:[%s3094_s1] sm:$0xff]  ;;  %v68_v2 = vld [vmem:[%s3093_s0 + $0x8] sm:$0xff]  ;;  %vm63_vm1 = vcmask 261120  }
  0x27   :  { %v67_v1 = vld [vmem:[%s3093_s0] sm:$0xff]  ;;  %2176 = vmatprep.subr.mxu0 %v75_v0  ;;  %2418 = vmatprep.subr.mxu1 %v75_v0  ;;  %v2635_v3 = vmov 0.0   ;;  %s2636_s14 = smov 64   ;;  %s2637_s17 = smov 32   ;;  %v72_v21 = vld [vmem:[%s3093_s0 + $0x28] sm:$0xff]  ;;  %v216_v23 = vld [vmem:[%s3095_s2 + $0x18] sm:$0xff] }
  0x28   :  { %2178 = vmatprep.mubr.msk.f32.mxu0 %vm83_vm0, %v67_v1  ;;  %2177 = vmatpush3.msra.mxu0 %v75_v0  ;;  %64 = vst.msk [vmem:[#allocation4] sm:$0xff] %vm63_vm1, %v2635_v3  ;;  %65 = vst.msk [vmem:[#allocation5] sm:$0xff] %vm63_vm1, %v2635_v3  ;;  %v2737_v4 = vld [vmem:[%s3097_s4] ss:$0 sm:$0xff]  ;;  %v214_v22 = vld [vmem:[%s3095_s2 + $0x8] sm:$0xff]  ;;  %v2638_v37 = vmov 0.0|0.0  }
  0x29   :  { %2179 = vmatmul.mubr.msk.f32.vlgmr.msra.gmra.mrb[0].mxu0 %vm83_vm0, %v68_v2  ;;  %2419 = vmatpush3.msra.mxu1 %v75_v0  ;;  %66 = vst.msk [vmem:[#allocation6] sm:$0xff] %vm63_vm1, %v2635_v3  ;;  %v71_v20 = vld [vmem:[%s3093_s0 + $0x20] sm:$0xff]  ;;  %v215_v25 = vld [vmem:[%s3095_s2 + $0x10] sm:$0xff]  ;;  %v2768_v26 = vpack.c.bf16 %v216_v23, %v214_v22  ;;  %v74_v29 = vld [vmem:[%s3093_s0 + $0x38] sm:$0xff]  ;;  %vm2639_vm2 = vmmov 0  }
  0x2a   :  { %2184 = vmatprep.mubr.msk.f32.mxu1 %vm83_vm0, %v71_v20  ;;  %v213_v24 = vld [vmem:[%s3095_s2] sm:$0xff]  ;;  %v73_v28 = vld [vmem:[%s3093_s0 + $0x30] sm:$0xff]  ;;  %v218_v30 = vld [vmem:[%s3095_s2 + $0x28] sm:$0xff] }
  0x2b   :  { %2185 = vmatmul.mubr.msk.f32.vlgmr.msra.gmra.mrb[0].mxu1 %vm83_vm0, %v72_v21  ;;  %v2770_v27 = vpack.c.bf16 %v215_v25, %v213_v24  ;;  %v220_v31 = vld [vmem:[%s3095_s2 + $0x38] sm:$0xff]  ;;  %v217_v32 = vld [vmem:[%s3095_s2 + $0x20] sm:$0xff]  ;;  %v219_v33 = vld [vmem:[%s3095_s2 + $0x30] sm:$0xff]  ;;  %2299 = vmatprep.subr.bf16.mxu1 %v2768_v26 }
  0x2c   :  { %2187 = vmatprep.mubr.msk.f32.mxu1 %vm83_vm0, %v73_v28  ;;  %v2792_v34 = vpack.c.bf16 %v220_v31, %v218_v30  ;;  %2313 = vmatprep.subr.bf16.mxu0 %v2768_v26  ;;  %v2796_v35 = vpack.c.bf16 %v219_v33, %v217_v32  ;;  %v221_v44 = vld [vmem:[#allocation7] sm:$0xff]  ;;  %v222_v45 = vld [vmem:[#allocation7 + $0x8] sm:$0xff]  ;;  %v223_v47 = vld [vmem:[#allocation7 + $0x10] sm:$0xff] }
  0x2d   :  { %2301 = vmatpush1.bf16.msra.mxu1 %v2770_v27  ;;  %2315 = vmatpush1.bf16.msra.mxu0 %v2770_v27  ;;  %v2817_v46 = vpack.c.bf16 %v222_v45, %v221_v44  ;;  %v224_v48 = vld [vmem:[#allocation7 + $0x18] sm:$0xff]  ;;  %v2840_v56 = vld [vmem:[%s3098_s5] ss:$0 sm:$0xff]  ;;  %v70_v23 = vld [vmem:[%s3093_s0 + $0x18] sm:$0xff] }
  0x2e   :  { %2303 = vmatprep.subr.bf16.mxu1 %v2792_v34  ;;  %2317 = vmatprep.subr.bf16.mxu0 %v2792_v34  ;;  %v2821_v50 = vpack.c.bf16 %v224_v48, %v223_v47  ;;  %v69_v22 = vld [vmem:[%s3093_s0 + $0x10] sm:$0xff] }
  0x2f   :  { %v227_v9 = vld [vmem:[#allocation4] sm:$0xff]  ;;  %2188 = vmatmul.mubr.msk.f32.gmra.mrb[2].mxu1 %vm83_vm0, %v74_v29  ;;  %v228_v51 = vld [vmem:[#allocation5] sm:$0xff]  ;;  %2181 = vmatprep.mubr.msk.f32.mxu0 %vm83_vm0, %v69_v22 }
  0x30   :  { %329 = vmatprep.mubr.f32.mxu1 %v2635_v3  ;;  %v229_v63 = vld [vmem:[#allocation6] sm:$0xff]  ;;  %2182 = vmatmul.mubr.msk.f32.gmra.mrb[2].mxu0 %vm83_vm0, %v70_v23 }
  0x31   :  { %2305 = vmatpush1.bf16.msra.mxu1 %v2796_v35  ;;  %2319 = vmatpush1.bf16.msra.mxu0 %v2796_v35 }
  0x32   :  { %2306 = vmatprep.subr.bf16.mxu1 %v2638_v37  ;;  %2327 = vmatprep.subr.bf16.mxu0 %v2768_v26 }
  0x33   :  { %544 = vmatprep.mubr.f32.mxu0 %v2635_v3 }
  0xfc   :  { %v2739_v5 = vpop.f32.mrb[0].mxu0 }
  0xfd   :  { %v174_v6 = vpop.f32.mrb[1].mxu0  ;;  %v180_v52 = vadd.f32 %v2739_v5, %v2737_v4 }
  0xfe   :  { %v175_v7 = vadd.f32 %v2737_v4, %v174_v6  ;;  %v2809_v40 = vpop.f32.mrb[0].mxu1 }
  0xff   :  { %v2811_v41 = vpop.f32.mrb[1].mxu1 }
 0x100   :  { %2431 = vtanh.f32 %v175_v7  ;;  %v2073_v10 = vmul.f32 -1.442695, %v175_v7 }
 0x102   :  { %2433 = vpow2.f32 %v2073_v10  ;;  %v2813_v42 = vpop.f32.mrb[2].mxu1 }
 0x103   :  { %v2815_v43 = vpop.f32.mrb[3].mxu1  ;;  %v2868_v31 = vpop.f32.mrb[2].mxu0 }
 0x104   :  { %v184_v32 = vpop.f32.mrb[3].mxu0 }
 0x10a   :  { %v2432_v8 = vpop.eup %2431 }
 0x10b   :  { %244 = vrot.lane.b32.xlu0 %v2432_v8, %s2636_s14 }
 0x10c   :  { %v2434_v11 = vpop.eup %2433 }
 0x10d   :  { %v234_v12 = vadd.f32 1.0, %v2434_v11 }
 0x10f   :  { %239 = vrot.lane.b32.xlu0 %v227_v9, %s2637_s17  ;;  %2435 = vrcp.f32 %v234_v12 }
 0x119   :  { %v2436_v13 = vpop.eup %2435 }
 0x17d   :  { %v245_v14 = vpop.permute.xlu0 %244 }
 0x17e   :  { %v247_v15 = vmul.f32 %v2436_v13, %v245_v14 }
 0x180   :  { %249 = vrot.lane.b32.xlu1 %v247_v15, %s2637_s17 }
 0x181   :  { %v240_v16 = vpop.permute.xlu0 %239 }
 0x182   :  { %v242_v17 = vmul.f32 %v2436_v13, %v240_v16 }
 0x1f2   :  { %v250_v18 = vpop.permute.xlu1 %249 }
 0x1f3   :  { %v2745_v19 = vadd.f32 %v250_v18, %v242_v17 }
 0x1f5   :  { %2437 = vtanh.f32 %v2745_v19 }
 0x1ff   :  { %v2438_v36 = vpop.eup %2437 }
 0x200   :  { %255 = vrot.lane.b32.xlu1 %v2438_v36, %s2636_s14 }
 0x272   :  { %v256_v38 = vpop.permute.xlu1 %255 }
 0x273   :  { %v258_v39 = vmul.f32 %v2436_v13, %v256_v38  ;;  %v185_v38 = vadd.f32 %v2737_v4, %v184_v32 }
 0x275   :  { %260 = vrot.lane.b32.xlu0 %v258_v39, %s2637_s17 }
 0x2e7   :  { %v261_v49 = vpop.permute.xlu0 %260 }
 0x2e8   :  { %2074 = vmatmul.mubr.msk.f32.vlgmr.msra.gmra.mrb[4].mxu1 %vm63_vm1, %v261_v49 }
 0x2e9   :  { %2308 = vmatpush3.bf16.msra.mxu1 %v2817_v46  ;;  %2198 = vmatprep.mubr.msk.f32.mxu1 %vm2639_vm2, %v2635_v3 }
 0x2ea   :  { %2309 = vmatprep.subr.bf16.mxu1 %v2638_v37 }
 0x2ed   :  { %2311 = vmatpush3.bf16.msra.mxu1 %v2821_v50 }
 0x2ee   :  { %2320 = vmatprep.subr.bf16.mxu1 %v2638_v37 }
 0x2f0   :  { %2199 = vmatmul.mubr.msk.f32.vlgmr.msra.gmra.mrb[6].mxu1 %vm63_vm1, %v228_v51 }
 0x2f1   :  { %2322 = vmatpush3.bf16.msra.mxu1 %v2817_v46  ;;  %2209 = vmatprep.mubr.msk.f32.mxu1 %vm2639_vm2, %v2635_v3 }
 0x2f2   :  { %2323 = vmatprep.subr.bf16.mxu1 %v2638_v37 }
 0x2f5   :  { %2325 = vmatpush3.bf16.msra.mxu1 %v2821_v50 }
 0x2f6   :  { %2334 = vmatprep.subr.bf16.mxu1 %v2638_v37 }
 0x3bb   :  { %v331_v53 = vpop.f32.mrb[4].mxu1 }
 0x3bc   :  { %v333_v54 = vpop.f32.mrb[5].mxu1 }
 0x3bd   :  { %v450_v55 = vadd.f32 %v333_v54, %v180_v52 }
 0x3bf   :  { %2439 = vtanh.f32 %v450_v55  ;;  %v2078_v0 = vmul.f32 -1.442695, %v450_v55 }
 0x3c3   :  { %v405_v57 = vpop.f32.mrb[6].mxu1 }
 0x3c4   :  { %v409_v58 = vadd.f32 %v405_v57, %v331_v53  ;;  %v2200_v59 = vpop.f32.mrb[7].mxu1 }
 0x3c6   :  { %v416_v60 = vadd.f32 %v2840_v56, %v409_v58 }
 0x3c8   :  { %2441 = vtanh.f32 %v416_v60  ;;  %v2077_v1 = vmul.f32 -1.442695, %v416_v60 }
 0x3c9   :  { %v2440_v61 = vpop.eup %2439  ;;  %2443 = vpow2.f32 %v2078_v0 }
 0x3ca   :  { %460 = vrot.lane.b32.xlu0 %v2440_v61, %s2636_s14  ;;  %2445 = vpow2.f32 %v2077_v1 }
 0x3d2   :  { %v2442_v62 = vpop.eup %2441 }
 0x3d3   :  { %430 = vrot.lane.b32.xlu1 %v2442_v62, %s2636_s14  ;;  %v2444_v2 = vpop.eup %2443 }
 0x3d4   :  { %v454_v5 = vadd.f32 1.0, %v2444_v2  ;;  %v2446_v6 = vpop.eup %2445 }
 0x3d5   :  { %v420_v7 = vadd.f32 1.0, %v2446_v6 }
 0x3d6   :  { %2447 = vrcp.f32 %v454_v5 }
 0x3d7   :  { %425 = vrot.lane.b32.xlu1 %v229_v63, %s2637_s17  ;;  %2449 = vrcp.f32 %v420_v7 }
 0x3e0   :  { %v2448_v8 = vpop.eup %2447 }
 0x3e1   :  { %v2450_v11 = vpop.eup %2449  ;;  %v458_v15 = vmul.f32 %v2448_v8, %v2745_v19 }
 0x43c   :  { %v461_v9 = vpop.permute.xlu0 %460 }
 0x43d   :  { %v463_v10 = vmul.f32 %v2448_v8, %v461_v9 }
 0x43f   :  { %465 = vrot.lane.b32.xlu1 %v463_v10, %s2637_s17 }
 0x445   :  { %v431_v12 = vpop.permute.xlu1 %430 }
 0x446   :  { %v433_v13 = vmul.f32 %v2450_v11, %v431_v12 }
 0x448   :  { %435 = vrot.lane.b32.xlu0 %v433_v13, %s2637_s17 }
 0x449   :  { %v426_v14 = vpop.permute.xlu1 %425 }
 0x44a   :  { %v428_v18 = vmul.f32 %v2450_v11, %v426_v14 }
 0x4b1   :  { %v466_v16 = vpop.permute.xlu1 %465 }
 0x4b2   :  { %v2849_v17 = vadd.f32 %v466_v16, %v458_v15 }
 0x4b4   :  { %2451 = vtanh.f32 %v2849_v17 }
 0x4ba   :  { %v436_v20 = vpop.permute.xlu0 %435 }
 0x4bb   :  { %v2852_v21 = vadd.f32 %v436_v20, %v428_v18  ;;  %v190_v20 = vadd.f32 %v2868_v31, %v2737_v4 }
 0x4bd   :  { %2453 = vtanh.f32 %v2852_v21 }
 0x4be   :  { %v2452_v19 = vpop.eup %2451 }
 0x4bf   :  { %471 = vrot.lane.b32.xlu1 %v2452_v19, %s2636_s14 }
 0x4c7   :  { %v2454_v24 = vpop.eup %2453 }
 0x4c8   :  { %441 = vrot.lane.b32.xlu0 %v2454_v24, %s2636_s14 }
 0x531   :  { %v472_v25 = vpop.permute.xlu1 %471 }
 0x532   :  { %v474_v28 = vmul.f32 %v2448_v8, %v472_v25 }
 0x534   :  { %476 = vrot.lane.b32.xlu1 %v474_v28, %s2637_s17 }
 0x53a   :  { %v442_v29 = vpop.permute.xlu0 %441 }
 0x53b   :  { %v444_v30 = vmul.f32 %v2450_v11, %v442_v29 }
 0x53d   :  { %446 = vrot.lane.b32.xlu0 %v444_v30, %s2637_s17 }
 0x5a6   :  { %v477_v33 = vpop.permute.xlu1 %476 }
 0x5a7   :  { %2079 = vmatmul.mubr.msk.f32.vlgmr.msra.gmra.mrb[4].mxu0 %vm63_vm1, %v477_v33 }
 0x5a8   :  { %2329 = vmatpush1.bf16.msra.mxu0 %v2770_v27  ;;  %748 = vmatprep.mubr.f32.mxu0 %v2635_v3 }
 0x5a9   :  { %2331 = vmatprep.subr.bf16.mxu0 %v2792_v34 }
 0x5ac   :  { %2333 = vmatpush1.bf16.msra.mxu0 %v2796_v35 }
 0x5ad   :  { %2341 = vmatprep.subr.bf16.mxu0 %v2768_v26 }
 0x5af   :  { %v447_v36 = vpop.permute.xlu0 %446 }
 0x5b0   :  { %449 = vst.msk [vmem:[#allocation2] sm:$0xff] %vm63_vm1, %v447_v36  ;;  %2210 = vmatmul.mubr.msk.f32.vlgmr.msra.gmra.mrb[8].mxu1 %vm63_vm1, %v447_v36 }
 0x5b1   :  { %2336 = vmatpush3.bf16.msra.mxu1 %v2817_v46  ;;  %2220 = vmatprep.mubr.msk.f32.mxu1 %vm2639_vm2, %v2635_v3 }
 0x5b2   :  { %2337 = vmatprep.subr.bf16.mxu1 %v2638_v37 }
 0x5b5   :  { %2339 = vmatpush3.bf16.msra.mxu1 %v2821_v50 }
 0x5b6   :  { %2348 = vmatprep.subr.bf16.mxu1 %v2638_v37 }
 0x67a   :  { %v546_v39 = vpop.f32.mrb[4].mxu0 }
 0x67b   :  { %v548_v44 = vpop.f32.mrb[5].mxu0 }
 0x67c   :  { %v654_v45 = vadd.f32 %v548_v44, %v185_v38 }
 0x67e   :  { %2455 = vtanh.f32 %v654_v45  ;;  %v2082_v54 = vmul.f32 -1.442695, %v654_v45 }
 0x683   :  { %v619_v47 = vpop.f32.mrb[8].mxu1 }
 0x684   :  { %v623_v48 = vadd.f32 %v619_v47, %v546_v39  ;;  %v2211_v49 = vpop.f32.mrb[9].mxu1 }
 0x686   :  { %v624_v51 = vadd.f32 %v2840_v56, %v623_v48 }
 0x688   :  { %v2456_v52 = vpop.eup %2455  ;;  %2457 = vtanh.f32 %v624_v51  ;;  %v2081_v55 = vmul.f32 -1.442695, %v624_v51 }
 0x689   :  { %664 = vrot.lane.b32.xlu1 %v2456_v52, %s2636_s14  ;;  %2459 = vpow2.f32 %v2082_v54 }
 0x68a   :  { %2461 = vpow2.f32 %v2081_v55 }
 0x692   :  { %v2458_v53 = vpop.eup %2457 }
 0x693   :  { %634 = vrot.lane.b32.xlu0 %v2458_v53, %s2636_s14  ;;  %v2460_v57 = vpop.eup %2459 }
 0x694   :  { %v658_v58 = vadd.f32 1.0, %v2460_v57  ;;  %v2462_v59 = vpop.eup %2461 }
 0x695   :  { %v628_v60 = vadd.f32 1.0, %v2462_v59 }
 0x696   :  { %2463 = vrcp.f32 %v658_v58 }
 0x697   :  { %2465 = vrcp.f32 %v628_v60 }
 0x6a0   :  { %v2464_v61 = vpop.eup %2463 }
 0x6a1   :  { %v2466_v0 = vpop.eup %2465  ;;  %v662_v5 = vmul.f32 %v2464_v61, %v2849_v17 }
 0x6a2   :  { %v632_v8 = vmul.f32 %v2466_v0, %v2852_v21 }
 0x6fb   :  { %v665_v62 = vpop.permute.xlu1 %664 }
 0x6fc   :  { %v667_v63 = vmul.f32 %v2464_v61, %v665_v62 }
 0x6fe   :  { %669 = vrot.lane.b32.xlu1 %v667_v63, %s2637_s17 }
 0x705   :  { %v635_v1 = vpop.permute.xlu0 %634 }
 0x706   :  { %v637_v2 = vmul.f32 %v2466_v0, %v635_v1 }
 0x708   :  { %639 = vrot.lane.b32.xlu0 %v637_v2, %s2637_s17 }
 0x770   :  { %v670_v6 = vpop.permute.xlu1 %669 }
 0x771   :  { %v2891_v7 = vadd.f32 %v670_v6, %v662_v5  ;;  %v195_v5 = vadd.f32 %v2737_v4, %v2811_v41 }
 0x773   :  { %2467 = vtanh.f32 %v2891_v7 }
 0x77a   :  { %v640_v9 = vpop.permute.xlu0 %639 }
 0x77b   :  { %v2895_v10 = vadd.f32 %v640_v9, %v632_v8 }
 0x77d   :  { %v2468_v11 = vpop.eup %2467  ;;  %2469 = vtanh.f32 %v2895_v10 }
 0x77e   :  { %675 = vrot.lane.b32.xlu1 %v2468_v11, %s2636_s14 }
 0x787   :  { %v2470_v12 = vpop.eup %2469 }
 0x788   :  { %645 = vrot.lane.b32.xlu0 %v2470_v12, %s2636_s14 }
 0x7f0   :  { %v676_v13 = vpop.permute.xlu1 %675 }
 0x7f1   :  { %v678_v14 = vmul.f32 %v2464_v61, %v676_v13 }
 0x7f3   :  { %680 = vrot.lane.b32.xlu1 %v678_v14, %s2637_s17 }
 0x7fa   :  { %v646_v15 = vpop.permute.xlu0 %645 }
 0x7fb   :  { %v648_v16 = vmul.f32 %v2466_v0, %v646_v15 }
 0x7fd   :  { %650 = vrot.lane.b32.xlu0 %v648_v16, %s2637_s17 }
 0x865   :  { %v681_v17 = vpop.permute.xlu1 %680 }
 0x866   :  { %2083 = vmatmul.mubr.msk.f32.vlgmr.msra.gmra.mrb[6].mxu0 %vm63_vm1, %v681_v17 }
 0x867   :  { %2343 = vmatpush1.bf16.msra.mxu0 %v2770_v27  ;;  %952 = vmatprep.mubr.f32.mxu0 %v2635_v3 }
 0x868   :  { %2345 = vmatprep.subr.bf16.mxu0 %v2792_v34 }
 0x86b   :  { %2347 = vmatpush1.bf16.msra.mxu0 %v2796_v35 }
 0x86c   :  { %2355 = vmatprep.subr.bf16.mxu0 %v2768_v26 }
 0x86f   :  { %v651_v18 = vpop.permute.xlu0 %650 }
 0x870   :  { %653 = vst.msk [vmem:[#allocation2 + $0x8] sm:$0xff] %vm63_vm1, %v651_v18  ;;  %2221 = vmatmul.mubr.msk.f32.vlgmr.msra.gmra.mrb[10].mxu1 %vm63_vm1, %v651_v18 }
 0x871   :  { %2350 = vmatpush3.bf16.msra.mxu1 %v2817_v46  ;;  %2231 = vmatprep.mubr.msk.f32.mxu1 %vm2639_vm2, %v2635_v3 }
 0x872   :  { %2351 = vmatprep.subr.bf16.mxu1 %v2638_v37 }
 0x875   :  { %2353 = vmatpush3.bf16.msra.mxu1 %v2821_v50 }
 0x876   :  { %2362 = vmatprep.subr.bf16.mxu1 %v2638_v37 }
 0x939   :  { %v750_v21 = vpop.f32.mrb[6].mxu0 }
 0x93a   :  { %v752_v22 = vpop.f32.mrb[7].mxu0 }
 0x93b   :  { %v858_v23 = vadd.f32 %v752_v22, %v190_v20 }
 0x93d   :  { %2471 = vtanh.f32 %v858_v23  ;;  %v2086_v32 = vmul.f32 -1.442695, %v858_v23 }
 0x943   :  { %v823_v19 = vpop.f32.mrb[10].mxu1 }
 0x944   :  { %v827_v24 = vadd.f32 %v823_v19, %v750_v21  ;;  %v2222_v25 = vpop.f32.mrb[11].mxu1 }
 0x946   :  { %v828_v28 = vadd.f32 %v2840_v56, %v827_v24 }
 0x947   :  { %v2472_v29 = vpop.eup %2471 }
 0x948   :  { %2473 = vtanh.f32 %v828_v28  ;;  %868 = vrot.lane.b32.xlu1 %v2472_v29, %s2636_s14  ;;  %v2085_v33 = vmul.f32 -1.442695, %v828_v28 }
 0x949   :  { %2475 = vpow2.f32 %v2086_v32 }
 0x94a   :  { %2477 = vpow2.f32 %v2085_v33 }
 0x952   :  { %v2474_v30 = vpop.eup %2473 }
 0x953   :  { %838 = vrot.lane.b32.xlu0 %v2474_v30, %s2636_s14  ;;  %v2476_v31 = vpop.eup %2475 }
 0x954   :  { %v862_v36 = vadd.f32 1.0, %v2476_v31  ;;  %v2478_v38 = vpop.eup %2477 }
 0x955   :  { %v832_v39 = vadd.f32 1.0, %v2478_v38 }
 0x956   :  { %2479 = vrcp.f32 %v862_v36 }
 0x957   :  { %2481 = vrcp.f32 %v832_v39 }
 0x960   :  { %v2480_v44 = vpop.eup %2479 }
 0x961   :  { %v2482_v48 = vpop.eup %2481  ;;  %v866_v52 = vmul.f32 %v2480_v44, %v2891_v7 }
 0x962   :  { %v836_v55 = vmul.f32 %v2482_v48, %v2895_v10 }
 0x9ba   :  { %v869_v45 = vpop.permute.xlu1 %868 }
 0x9bb   :  { %v871_v47 = vmul.f32 %v2480_v44, %v869_v45 }
 0x9bd   :  { %873 = vrot.lane.b32.xlu1 %v871_v47, %s2637_s17 }
 0x9c5   :  { %v839_v49 = vpop.permute.xlu0 %838 }
 0x9c6   :  { %v841_v51 = vmul.f32 %v2482_v48, %v839_v49 }
 0x9c8   :  { %843 = vrot.lane.b32.xlu0 %v841_v51, %s2637_s17  ;;  %v200_v51 = vadd.f32 %v2809_v40, %v2737_v4 }
 0xa2f   :  { %v874_v53 = vpop.permute.xlu1 %873 }
 0xa30   :  { %v2924_v54 = vadd.f32 %v874_v53, %v866_v52 }
 0xa32   :  { %2483 = vtanh.f32 %v2924_v54 }
 0xa3a   :  { %v844_v57 = vpop.permute.xlu0 %843 }
 0xa3b   :  { %v2928_v58 = vadd.f32 %v844_v57, %v836_v55 }
 0xa3c   :  { %v2484_v59 = vpop.eup %2483 }
 0xa3d   :  { %2485 = vtanh.f32 %v2928_v58  ;;  %879 = vrot.lane.b32.xlu1 %v2484_v59, %s2636_s14 }
 0xa47   :  { %v2486_v60 = vpop.eup %2485 }
 0xa48   :  { %849 = vrot.lane.b32.xlu0 %v2486_v60, %s2636_s14 }
 0xaaf   :  { %v880_v61 = vpop.permute.xlu1 %879 }
 0xab0   :  { %v882_v62 = vmul.f32 %v2480_v44, %v880_v61 }
 0xab2   :  { %884 = vrot.lane.b32.xlu1 %v882_v62, %s2637_s17 }
 0xaba   :  { %v850_v63 = vpop.permute.xlu0 %849 }
 0xabb   :  { %v852_v0 = vmul.f32 %v2482_v48, %v850_v63 }
 0xabd   :  { %854 = vrot.lane.b32.xlu0 %v852_v0, %s2637_s17 }
 0xb24   :  { %v885_v1 = vpop.permute.xlu1 %884 }
 0xb25   :  { %2087 = vmatmul.mubr.msk.f32.vlgmr.msra.gmra.mrb[8].mxu0 %vm63_vm1, %v885_v1 }
 0xb26   :  { %2357 = vmatpush1.bf16.msra.mxu0 %v2770_v27  ;;  %1156 = vmatprep.mubr.f32.mxu0 %v2635_v3 }
 0xb27   :  { %2359 = vmatprep.subr.bf16.mxu0 %v2792_v34 }
 0xb2a   :  { %2361 = vmatpush1.bf16.msra.mxu0 %v2796_v35 }
 0xb2b   :  { %2369 = vmatprep.subr.bf16.mxu0 %v2768_v26 }
 0xb2f   :  { %v855_v2 = vpop.permute.xlu0 %854 }
 0xb30   :  { %857 = vst.msk [vmem:[#allocation2 + $0x10] sm:$0xff] %vm63_vm1, %v855_v2  ;;  %2232 = vmatmul.mubr.msk.f32.vlgmr.msra.gmra.mrb[12].mxu1 %vm63_vm1, %v855_v2 }
 0xb31   :  { %2364 = vmatpush3.bf16.msra.mxu1 %v2817_v46  ;;  %2242 = vmatprep.mubr.msk.f32.mxu1 %vm2639_vm2, %v2635_v3 }
 0xb32   :  { %2365 = vmatprep.subr.bf16.mxu1 %v2638_v37 }
 0xb35   :  { %2367 = vmatpush3.bf16.msra.mxu1 %v2821_v50 }
 0xb36   :  { %2376 = vmatprep.subr.bf16.mxu1 %v2638_v37 }
 0xbf8   :  { %v954_v6 = vpop.f32.mrb[8].mxu0 }
 0xbf9   :  { %v956_v7 = vpop.f32.mrb[9].mxu0 }
 0xbfa   :  { %v1062_v8 = vadd.f32 %v956_v7, %v195_v5 }
 0xbfc   :  { %2487 = vtanh.f32 %v1062_v8  ;;  %v2090_v15 = vmul.f32 -1.442695, %v1062_v8 }
 0xc03   :  { %v1027_v9 = vpop.f32.mrb[12].mxu1 }
 0xc04   :  { %v1031_v10 = vadd.f32 %v1027_v9, %v954_v6  ;;  %v2233_v11 = vpop.f32.mrb[13].mxu1 }
 0xc06   :  { %v2488_v12 = vpop.eup %2487  ;;  %v1032_v13 = vadd.f32 %v2840_v56, %v1031_v10 }
 0xc07   :  { %1072 = vrot.lane.b32.xlu1 %v2488_v12, %s2636_s14 }
 0xc08   :  { %2489 = vtanh.f32 %v1032_v13  ;;  %v2089_v16 = vmul.f32 -1.442695, %v1032_v13 }
 0xc09   :  { %2491 = vpow2.f32 %v2090_v15 }
 0xc0a   :  { %2493 = vpow2.f32 %v2089_v16 }
 0xc12   :  { %v2490_v14 = vpop.eup %2489 }
 0xc13   :  { %1042 = vrot.lane.b32.xlu0 %v2490_v14, %s2636_s14  ;;  %v2492_v41 = vpop.eup %2491 }
 0xc14   :  { %v1066_v17 = vadd.f32 1.0, %v2492_v41  ;;  %v2494_v18 = vpop.eup %2493 }
 0xc15   :  { %v1036_v20 = vadd.f32 1.0, %v2494_v18 }
 0xc16   :  { %2495 = vrcp.f32 %v1066_v17 }
 0xc17   :  { %2497 = vrcp.f32 %v1036_v20 }
 0xc20   :  { %v2496_v21 = vpop.eup %2495 }
 0xc21   :  { %v2498_v19 = vpop.eup %2497  ;;  %v1070_v28 = vmul.f32 %v2496_v21, %v2924_v54 }
 0xc22   :  { %v1040_v32 = vmul.f32 %v2498_v19, %v2928_v58 }
 0xc79   :  { %v1073_v22 = vpop.permute.xlu1 %1072 }
 0xc7a   :  { %v1075_v23 = vmul.f32 %v2496_v21, %v1073_v22 }
 0xc7c   :  { %1077 = vrot.lane.b32.xlu1 %v1075_v23, %s2637_s17 }
 0xc85   :  { %v1043_v24 = vpop.permute.xlu0 %1042 }
 0xc86   :  { %v1045_v25 = vmul.f32 %v2498_v19, %v1043_v24  ;;  %v205_v24 = vadd.f32 %v2737_v4, %v2815_v43 }
 0xc88   :  { %1047 = vrot.lane.b32.xlu0 %v1045_v25, %s2637_s17 }
 0xcee   :  { %v1078_v29 = vpop.permute.xlu1 %1077 }
 0xcef   :  { %v2957_v30 = vadd.f32 %v1078_v29, %v1070_v28 }
 0xcf1   :  { %2499 = vtanh.f32 %v2957_v30 }
 0xcfa   :  { %v1048_v33 = vpop.permute.xlu0 %1047 }
 0xcfb   :  { %v2500_v31 = vpop.eup %2499  ;;  %v1050_v36 = vadd.f32 %v1048_v33, %v1040_v32 }
 0xcfc   :  { %1083 = vrot.lane.b32.xlu1 %v2500_v31, %s2636_s14 }
 0xcfd   :  { %2501 = vtanh.f32 %v1050_v36 }
 0xd07   :  { %v2502_v38 = vpop.eup %2501 }
 0xd08   :  { %1053 = vrot.lane.b32.xlu0 %v2502_v38, %s2636_s14 }
 0xd6e   :  { %v1084_v39 = vpop.permute.xlu1 %1083 }
 0xd6f   :  { %v1086_v44 = vmul.f32 %v2496_v21, %v1084_v39 }
 0xd71   :  { %1088 = vrot.lane.b32.xlu1 %v1086_v44, %s2637_s17 }
 0xd7a   :  { %v1054_v45 = vpop.permute.xlu0 %1053 }
 0xd7b   :  { %v1056_v47 = vmul.f32 %v2498_v19, %v1054_v45 }
 0xd7d   :  { %1058 = vrot.lane.b32.xlu0 %v1056_v47, %s2637_s17 }
 0xde3   :  { %v1089_v48 = vpop.permute.xlu1 %1088 }
 0xde4   :  { %2091 = vmatmul.mubr.msk.f32.vlgmr.msra.gmra.mrb[10].mxu0 %vm63_vm1, %v1089_v48 }
 0xde5   :  { %2371 = vmatpush1.bf16.msra.mxu0 %v2770_v27  ;;  %1360 = vmatprep.mubr.f32.mxu0 %v2635_v3 }
 0xde6   :  { %2373 = vmatprep.subr.bf16.mxu0 %v2792_v34 }
 0xde9   :  { %2375 = vmatpush1.bf16.msra.mxu0 %v2796_v35 }
 0xdea   :  { %2383 = vmatprep.subr.bf16.mxu0 %v2768_v26 }
 0xdef   :  { %v1059_v49 = vpop.permute.xlu0 %1058 }
 0xdf0   :  { %1061 = vst.msk [vmem:[#allocation2 + $0x18] sm:$0xff] %vm63_vm1, %v1059_v49  ;;  %2243 = vmatmul.mubr.msk.f32.vlgmr.msra.gmra.mrb[14].mxu1 %vm63_vm1, %v1059_v49 }
 0xdf1   :  { %2378 = vmatpush3.bf16.msra.mxu1 %v2817_v46  ;;  %2253 = vmatprep.mubr.msk.f32.mxu1 %vm2639_vm2, %v2635_v3 }
 0xdf2   :  { %2379 = vmatprep.subr.bf16.mxu1 %v2638_v37 }
 0xdf5   :  { %2381 = vmatpush3.bf16.msra.mxu1 %v2821_v50 }
 0xdf6   :  { %2390 = vmatprep.subr.bf16.mxu1 %v2638_v37 }
 0xeb7   :  { %v1158_v52 = vpop.f32.mrb[10].mxu0 }
 0xeb8   :  { %v1160_v53 = vpop.f32.mrb[11].mxu0 }
 0xeb9   :  { %v1266_v54 = vadd.f32 %v1160_v53, %v200_v51 }
 0xebb   :  { %2503 = vtanh.f32 %v1266_v54  ;;  %v2094_v62 = vmul.f32 -1.442695, %v1266_v54 }
 0xec3   :  { %v1231_v55 = vpop.f32.mrb[14].mxu1 }
 0xec4   :  { %v1235_v57 = vadd.f32 %v1231_v55, %v1158_v52  ;;  %v2244_v58 = vpop.f32.mrb[15].mxu1 }
 0xec5   :  { %v2504_v59 = vpop.eup %2503 }
 0xec6   :  { %v1236_v60 = vadd.f32 %v2840_v56, %v1235_v57  ;;  %1276 = vrot.lane.b32.xlu1 %v2504_v59, %s2636_s14 }
 0xec8   :  { %2505 = vtanh.f32 %v1236_v60  ;;  %v2093_v63 = vmul.f32 -1.442695, %v1236_v60 }
 0xec9   :  { %2507 = vpow2.f32 %v2094_v62 }
 0xeca   :  { %2509 = vpow2.f32 %v2093_v63 }
 0xed2   :  { %v2506_v61 = vpop.eup %2505 }
 0xed3   :  { %1246 = vrot.lane.b32.xlu0 %v2506_v61, %s2636_s14  ;;  %v2508_v40 = vpop.eup %2507 }
 0xed4   :  { %v1270_v0 = vadd.f32 1.0, %v2508_v40  ;;  %v2510_v1 = vpop.eup %2509 }
 0xed5   :  { %v1240_v2 = vadd.f32 1.0, %v2510_v1 }
 0xed6   :  { %2511 = vrcp.f32 %v1270_v0 }
 0xed7   :  { %2513 = vrcp.f32 %v1240_v2 }
 0xee0   :  { %v2512_v5 = vpop.eup %2511 }
 0xee1   :  { %v2514_v8 = vpop.eup %2513  ;;  %v1274_v11 = vmul.f32 %v2512_v5, %v2957_v30 }
 0xee2   :  { %v1244_v14 = vmul.f32 %v2514_v8, %v1050_v36 }
 0xf38   :  { %v1277_v6 = vpop.permute.xlu1 %1276 }
 0xf39   :  { %v1279_v7 = vmul.f32 %v2512_v5, %v1277_v6 }
 0xf3b   :  { %1281 = vrot.lane.b32.xlu1 %v1279_v7, %s2637_s17 }
 0xf45   :  { %v1247_v9 = vpop.permute.xlu0 %1246 }
 0xf46   :  { %v1249_v10 = vmul.f32 %v2514_v8, %v1247_v9 }
 0xf48   :  { %1251 = vrot.lane.b32.xlu0 %v1249_v10, %s2637_s17 }
 0xfad   :  { %v1282_v12 = vpop.permute.xlu1 %1281 }
 0xfae   :  { %v2987_v13 = vadd.f32 %v1282_v12, %v1274_v11 }
 0xfb0   :  { %2515 = vtanh.f32 %v2987_v13 }
 0xfba   :  { %v2516_v15 = vpop.eup %2515  ;;  %v1252_v16 = vpop.permute.xlu0 %1251 }
 0xfbb   :  { %v2990_v41 = vadd.f32 %v1252_v16, %v1244_v14  ;;  %1287 = vrot.lane.b32.xlu1 %v2516_v15, %s2636_s14 }
 0xfbd   :  { %2517 = vtanh.f32 %v2990_v41 }
 0xfc7   :  { %v2518_v17 = vpop.eup %2517 }
 0xfc8   :  { %1257 = vrot.lane.b32.xlu0 %v2518_v17, %s2636_s14 }
0x102d   :  { %v1288_v18 = vpop.permute.xlu1 %1287 }
0x102e   :  { %v1290_v20 = vmul.f32 %v2512_v5, %v1288_v18 }
0x1030   :  { %1292 = vrot.lane.b32.xlu1 %v1290_v20, %s2637_s17 }
0x103a   :  { %v1258_v21 = vpop.permute.xlu0 %1257 }
0x103b   :  { %v1260_v22 = vmul.f32 %v2514_v8, %v1258_v21 }
0x103d   :  { %1262 = vrot.lane.b32.xlu0 %v1260_v22, %s2637_s17 }
0x10a2   :  { %v1293_v23 = vpop.permute.xlu1 %1292 }
0x10a3   :  { %2095 = vmatmul.mubr.msk.f32.vlgmr.msra.gmra.mrb[12].mxu0 %vm63_vm1, %v1293_v23 }
0x10a4   :  { %2385 = vmatpush1.bf16.msra.mxu0 %v2770_v27  ;;  %1564 = vmatprep.mubr.f32.mxu0 %v2635_v3 }
0x10a5   :  { %2387 = vmatprep.subr.bf16.mxu0 %v2792_v34 }
0x10a8   :  { %2389 = vmatpush1.bf16.msra.mxu0 %v2796_v35 }
0x10a9   :  { %2397 = vmatprep.subr.bf16.mxu0 %v2768_v26 }
0x10af   :  { %v1263_v19 = vpop.permute.xlu0 %1262 }
0x10b0   :  { %1265 = vst.msk [vmem:[#allocation2 + $0x20] sm:$0xff] %vm63_vm1, %v1263_v19  ;;  %2254 = vmatmul.mubr.msk.f32.vlgmr.msra.gmra.mrb[16].mxu1 %vm63_vm1, %v1263_v19 }
0x10b1   :  { %2392 = vmatpush3.bf16.msra.mxu1 %v2817_v46  ;;  %2264 = vmatprep.mubr.msk.f32.mxu1 %vm2639_vm2, %v2635_v3 }
0x10b2   :  { %2393 = vmatprep.subr.bf16.mxu1 %v2638_v37 }
0x10b5   :  { %2395 = vmatpush3.bf16.msra.mxu1 %v2821_v50 }
0x10b6   :  { %2404 = vmatprep.subr.bf16.mxu1 %v2638_v37 }
0x1176   :  { %v1362_v26 = vpop.f32.mrb[12].mxu0 }
0x1177   :  { %v1364_v25 = vpop.f32.mrb[13].mxu0 }
0x1178   :  { %v1470_v28 = vadd.f32 %v1364_v25, %v205_v24  ;;  %v1898_v25 = vld [vmem:[#allocation10] sm:$0xff] }
0x117a   :  { %2519 = vtanh.f32 %v1470_v28  ;;  %v2098_v38 = vmul.f32 -1.442695, %v1470_v28  ;;  %v1899_v28 = vld [vmem:[#allocation10 + $0x8] sm:$0xff] }
0x1183   :  { %v1435_v29 = vpop.f32.mrb[16].mxu1 }
0x1184   :  { %v2520_v30 = vpop.eup %2519  ;;  %v1439_v32 = vadd.f32 %v1435_v29, %v1362_v26  ;;  %v2255_v33 = vpop.f32.mrb[17].mxu1  ;;  %v2410_v29 = vpack.c.bf16 %v1899_v28, %v1898_v25 }
0x1185   :  { %1480 = vrot.lane.b32.xlu1 %v2520_v30, %s2636_s14 }
0x1186   :  { %v1440_v31 = vadd.f32 %v2840_v56, %v1439_v32 }
0x1188   :  { %2521 = vtanh.f32 %v1440_v31  ;;  %v2097_v43 = vmul.f32 -1.442695, %v1440_v31 }
0x1189   :  { %2523 = vpow2.f32 %v2098_v38  ;;  %v1900_v38 = vld [vmem:[#allocation10 + $0x10] sm:$0xff] }
0x118a   :  { %2525 = vpow2.f32 %v2097_v43 }
0x1192   :  { %v2522_v36 = vpop.eup %2521 }
0x1193   :  { %1450 = vrot.lane.b32.xlu0 %v2522_v36, %s2636_s14  ;;  %v2524_v39 = vpop.eup %2523 }
0x1194   :  { %v1474_v44 = vadd.f32 1.0, %v2524_v39  ;;  %v2526_v45 = vpop.eup %2525  ;;  %v1901_v39 = vld [vmem:[#allocation10 + $0x18] sm:$0xff] }
0x1195   :  { %v1444_v48 = vadd.f32 1.0, %v2526_v45  ;;  %v2414_v43 = vpack.c.bf16 %v1901_v39, %v1900_v38  ;;  %v1890_v45 = vld [vmem:[#allocation2] sm:$0xff] }
0x1196   :  { %2527 = vrcp.f32 %v1474_v44 }
0x1197   :  { %2529 = vrcp.f32 %v1444_v48  ;;  %v1892_v48 = vld [vmem:[#allocation2 + $0x10] sm:$0xff] }
0x11a0   :  { %v2528_v47 = vpop.eup %2527 }
0x11a1   :  { %v2530_v52 = vpop.eup %2529  ;;  %v1478_v55 = vmul.f32 %v2528_v47, %v2987_v13 }
0x11a2   :  { %v1448_v60 = vmul.f32 %v2530_v52, %v2990_v41 }
0x11f7   :  { %v1481_v49 = vpop.permute.xlu1 %1480 }
0x11f8   :  { %v1483_v51 = vmul.f32 %v2528_v47, %v1481_v49  ;;  %v1893_v49 = vld [vmem:[#allocation2 + $0x18] sm:$0xff] }
0x11fa   :  { %1485 = vrot.lane.b32.xlu1 %v1483_v51, %s2637_s17  ;;  %v1894_v51 = vld [vmem:[#allocation2 + $0x20] sm:$0xff] }
0x1205   :  { %v1451_v53 = vpop.permute.xlu0 %1450 }
0x1206   :  { %v1453_v54 = vmul.f32 %v2530_v52, %v1451_v53 }
0x1208   :  { %1455 = vrot.lane.b32.xlu0 %v1453_v54, %s2637_s17 }
0x126c   :  { %v1486_v57 = vpop.permute.xlu1 %1485 }
0x126d   :  { %v1488_v58 = vadd.f32 %v1486_v57, %v1478_v55 }
0x126f   :  { %2531 = vtanh.f32 %v1488_v58 }
0x1279   :  { %v2532_v59 = vpop.eup %2531 }
0x127a   :  { %v1456_v61 = vpop.permute.xlu0 %1455  ;;  %1491 = vrot.lane.b32.xlu1 %v2532_v59, %s2636_s14 }
0x127b   :  { %v1458_v62 = vadd.f32 %v1456_v61, %v1448_v60 }
0x127d   :  { %2533 = vtanh.f32 %v1458_v62 }
0x1287   :  { %v2534_v63 = vpop.eup %2533 }
0x1288   :  { %1461 = vrot.lane.b32.xlu0 %v2534_v63, %s2636_s14 }
0x12ec   :  { %v1492_v40 = vpop.permute.xlu1 %1491 }
0x12ed   :  { %v1494_v0 = vmul.f32 %v2528_v47, %v1492_v40  ;;  %v1891_v47 = vld [vmem:[#allocation2 + $0x8] sm:$0xff] }
0x12ef   :  { %1496 = vrot.lane.b32.xlu1 %v1494_v0, %s2637_s17 }
0x12fa   :  { %v1462_v1 = vpop.permute.xlu0 %1461 }
0x12fb   :  { %v1464_v2 = vmul.f32 %v2530_v52, %v1462_v1 }
0x12fd   :  { %1466 = vrot.lane.b32.xlu0 %v1464_v2, %s2637_s17 }
0x1361   :  { %v1497_v5 = vpop.permute.xlu1 %1496 }
0x1362   :  { %2099 = vmatmul.mubr.msk.f32.vlgmr.msra.gmra.mrb[14].mxu0 %vm63_vm1, %v1497_v5 }
0x1363   :  { %2399 = vmatpush1.bf16.msra.mxu0 %v2770_v27  ;;  %1768 = vmatprep.mubr.f32.mxu0 %v2635_v3  ;;  %v210_v27 = vadd.f32 %v2813_v42, %v2737_v4 }
0x1364   :  { %2401 = vmatprep.subr.bf16.mxu0 %v2792_v34 }
0x1367   :  { %2403 = vmatpush1.bf16.msra.mxu0 %v2796_v35 }
0x1368   :  { %2411 = vmatprep.subr.bf16.mxu0 %v2410_v29 }
0x136f   :  { %v1467_v6 = vpop.permute.xlu0 %1466 }
0x1370   :  { %1469 = vst.msk [vmem:[#allocation2 + $0x28] sm:$0xff] %vm63_vm1, %v1467_v6  ;;  %2265 = vmatmul.mubr.msk.f32.vlgmr.msra.gmra.mrb[18].mxu1 %vm63_vm1, %v1467_v6 }
0x1371   :  { %2406 = vmatpush3.bf16.msra.mxu1 %v2817_v46  ;;  %2275 = vmatprep.mubr.msk.f32.mxu1 %vm2639_vm2, %v2635_v3 }
0x1372   :  { %2407 = vmatprep.subr.bf16.mxu1 %v2638_v37 }
0x1375   :  { %2409 = vmatpush3.bf16.msra.mxu1 %v2821_v50 }
0x1377   :  { %v1895_v53 = vld [vmem:[#allocation2 + $0x28] sm:$0xff] }
0x1435   :  { %v1566_v34 = vpop.f32.mrb[14].mxu0 }
0x1436   :  { %v1568_v7 = vpop.f32.mrb[15].mxu0 }
0x1437   :  { %v1674_v35 = vadd.f32 %v1568_v7, %v210_v27 }
0x1439   :  { %2535 = vtanh.f32 %v1674_v35  ;;  %v2102_v37 = vmul.f32 -1.442695, %v1674_v35 }
0x1443   :  { %v2536_v8 = vpop.eup %2535  ;;  %v1639_v9 = vpop.f32.mrb[18].mxu1 }
0x1444   :  { %v1643_v10 = vadd.f32 %v1639_v9, %v1566_v34  ;;  %v2266_v11 = vpop.f32.mrb[19].mxu1  ;;  %1684 = vrot.lane.b32.xlu1 %v2536_v8, %s2636_s14 }
0x1446   :  { %v1644_v46 = vadd.f32 %v2840_v56, %v1643_v10 }
0x1448   :  { %2537 = vtanh.f32 %v1644_v46  ;;  %v2101_v4 = vmul.f32 -1.442695, %v1644_v46 }
0x1449   :  { %2539 = vpow2.f32 %v2102_v37 }
0x144a   :  { %2541 = vpow2.f32 %v2101_v4 }
0x1452   :  { %v2538_v3 = vpop.eup %2537 }
0x1453   :  { %1654 = vrot.lane.b32.xlu0 %v2538_v3, %s2636_s14  ;;  %v2540_v50 = vpop.eup %2539 }
0x1454   :  { %v1678_v42 = vadd.f32 1.0, %v2540_v50  ;;  %v2542_v12 = vpop.eup %2541 }
0x1455   :  { %v1648_v16 = vadd.f32 1.0, %v2542_v12 }
0x1456   :  { %2543 = vrcp.f32 %v1678_v42 }
0x1457   :  { %2545 = vrcp.f32 %v1648_v16 }
0x1460   :  { %v2544_v13 = vpop.eup %2543 }
0x1461   :  { %v2546_v41 = vpop.eup %2545  ;;  %v1682_v20 = vmul.f32 %v2544_v13, %v1488_v58  ;;  %v2106_v58 = vld [vmem:[%s3100_s7] ss:$0 sm:$0xff]  ;;  %s2640_s7 = smov 96  }
0x1462   :  { %v1652_v19 = vmul.f32 %v2546_v41, %v1458_v62 }
0x14b6   :  { %v1685_v14 = vpop.permute.xlu1 %1684 }
0x14b7   :  { %v1687_v15 = vmul.f32 %v2544_v13, %v1685_v14 }
0x14b9   :  { %1689 = vrot.lane.b32.xlu1 %v1687_v15, %s2637_s17 }
0x14c5   :  { %v1655_v17 = vpop.permute.xlu0 %1654 }
0x14c6   :  { %v1657_v18 = vmul.f32 %v2546_v41, %v1655_v17 }
0x14c8   :  { %1659 = vrot.lane.b32.xlu0 %v1657_v18, %s2637_s17 }
0x152b   :  { %v1690_v21 = vpop.permute.xlu1 %1689 }
0x152c   :  { %v3043_v22 = vadd.f32 %v1690_v21, %v1682_v20 }
0x152e   :  { %2547 = vtanh.f32 %v3043_v22 }
0x1538   :  { %v2548_v23 = vpop.eup %2547 }
0x1539   :  { %1695 = vrot.lane.b32.xlu1 %v2548_v23, %s2636_s14 }
0x153a   :  { %v1660_v24 = vpop.permute.xlu0 %1659 }
0x153b   :  { %v3047_v26 = vadd.f32 %v1660_v24, %v1652_v19 }
0x153d   :  { %2549 = vtanh.f32 %v3047_v26 }
0x1547   :  { %v2550_v30 = vpop.eup %2549 }
0x1548   :  { %1665 = vrot.lane.b32.xlu0 %v2550_v30, %s2636_s14 }
0x15ab   :  { %v1696_v32 = vpop.permute.xlu1 %1695 }
0x15ac   :  { %v1698_v33 = vmul.f32 %v2544_v13, %v1696_v32 }
0x15ae   :  { %1700 = vrot.lane.b32.xlu1 %v1698_v33, %s2637_s17 }
0x15ba   :  { %v1666_v31 = vpop.permute.xlu0 %1665 }
0x15bb   :  { %v1668_v36 = vmul.f32 %v2546_v41, %v1666_v31 }
0x15bd   :  { %1670 = vrot.lane.b32.xlu0 %v1668_v36, %s2637_s17 }
0x1620   :  { %v1701_v44 = vpop.permute.xlu1 %1700 }
0x1621   :  { %2103 = vmatmul.mubr.msk.f32.vlgmr.msra.gmra.mrb[16].mxu0 %vm63_vm1, %v1701_v44 }
0x1622   :  { %2413 = vmatpush3.bf16.msra.mxu0 %v2410_v29  ;;  %2286 = vmatprep.mubr.msk.f32.mxu0 %vm63_vm1, %v1890_v45 }
0x1623   :  { %2415 = vmatprep.subr.bf16.mxu0 %v2414_v43 }
0x1626   :  { %2417 = vmatpush3.bf16.msra.mxu0 %v2414_v43 }
0x1629   :  { %2287 = vmatmul.mubr.msk.f32.vlgmr.msra.gmra.mrb[18].mxu0 %vm63_vm1, %v1891_v47 }
0x162a   :  { %2289 = vmatprep.mubr.msk.f32.mxu0 %vm63_vm1, %v1892_v48 }
0x162d   :  { %2290 = vmatmul.mubr.msk.f32.gmra.mrb[20].mxu0 %vm63_vm1, %v1893_v49 }
0x162e   :  { %2292 = vmatprep.mubr.msk.f32.mxu0 %vm63_vm1, %v1894_v51 }
0x162f   :  { %v1671_v52 = vpop.permute.xlu0 %1670 }
0x1630   :  { %1673 = vst.msk [vmem:[#allocation2 + $0x30] sm:$0xff] %vm63_vm1, %v1671_v52  ;;  %2276 = vmatmul.mubr.msk.f32.vlgmr.msra.gmra.mrb[20].mxu1 %vm63_vm1, %v1671_v52 }
0x1631   :  { %2293 = vmatmul.mubr.msk.f32.gmra.mrb[22].mxu0 %vm63_vm1, %v1895_v53 }
0x1637   :  { %v1896_v54 = vld [vmem:[#allocation2 + $0x30] sm:$0xff] }
0x1638   :  { %2295 = vmatprep.mubr.msk.f32.mxu0 %vm63_vm1, %v1896_v54 }
0x16f4   :  { %v1770_v55 = vpop.f32.mrb[16].mxu0 }
0x16f5   :  { %v1772_v57 = vpop.f32.mrb[17].mxu0 }
0x16fc   :  { %v2288_v59 = vpop.f32.mrb[18].mxu0 }
0x16fd   :  { %v2005_v60 = vadd.f32 %v2288_v59, %v2106_v58  ;;  %v1999_v61 = vpop.f32.mrb[19].mxu0 }
0x16fe   :  { %v2000_v62 = vadd.f32 %v2106_v58, %v1999_v61 }
0x16ff   :  { %2039 = vst [vmem:[#allocation12 + $0x8] sm:$0xff] %v2005_v60 }
0x1700   :  { %2038 = vst [vmem:[#allocation12] sm:$0xff] %v2000_v62  ;;  %v2291_v63 = vpop.f32.mrb[20].mxu0 }
0x1701   :  { %v2015_v40 = vadd.f32 %v2291_v63, %v2106_v58  ;;  %v2009_v0 = vpop.f32.mrb[21].mxu0 }
0x1702   :  { %v2010_v1 = vadd.f32 %v2106_v58, %v2009_v0 }
0x1703   :  { %2041 = vst [vmem:[#allocation12 + $0x18] sm:$0xff] %v2015_v40  ;;  %v1843_v2 = vpop.f32.mrb[20].mxu1 }
0x1704   :  { %2040 = vst [vmem:[#allocation12 + $0x10] sm:$0xff] %v2010_v1  ;;  %v2294_v5 = vpop.f32.mrb[22].mxu0  ;;  %v1847_v6 = vadd.f32 %v1843_v2, %v1770_v55  ;;  %v2277_v27 = vpop.f32.mrb[21].mxu1 }
0x1705   :  { %v2025_v34 = vadd.f32 %v2294_v5, %v2106_v58  ;;  %v2019_v7 = vpop.f32.mrb[23].mxu0 }
0x1706   :  { %v2020_v35 = vadd.f32 %v2106_v58, %v2019_v7  ;;  %v1848_v8 = vadd.f32 %v2840_v56, %v1847_v6 }
0x1707   :  { %2043 = vst [vmem:[#allocation12 + $0x28] sm:$0xff] %v2025_v34 }
0x1708   :  { %2042 = vst [vmem:[#allocation12 + $0x20] sm:$0xff] %v2020_v35  ;;  %2551 = vtanh.f32 %v1848_v8  ;;  %v2105_v10 = vmul.f32 -1.442695, %v1848_v8 }
0x170a   :  { %2553 = vpow2.f32 %v2105_v10 }
0x1712   :  { %v2552_v9 = vpop.eup %2551 }
0x1713   :  { %1858 = vrot.lane.b32.xlu0 %v2552_v9, %s2636_s14 }
0x1714   :  { %v2554_v11 = vpop.eup %2553 }
0x1715   :  { %v1852_v46 = vadd.f32 1.0, %v2554_v11 }
0x1717   :  { %2555 = vrcp.f32 %v1852_v46 }
0x1721   :  { %v2556_v3 = vpop.eup %2555 }
0x1722   :  { %v1856_v4 = vmul.f32 %v2556_v3, %v3047_v26 }
0x1785   :  { %v1859_v37 = vpop.permute.xlu0 %1858 }
0x1786   :  { %v1861_v50 = vmul.f32 %v2556_v3, %v1859_v37 }
0x1788   :  { %1863 = vrot.lane.b32.xlu1 %v1861_v50, %s2637_s17 }
0x17fa   :  { %v1864_v42 = vpop.permute.xlu1 %1863 }
0x17fb   :  { %v1866_v56 = vadd.f32 %v1864_v42, %v1856_v4 }
0x17fd   :  { %2557 = vtanh.f32 %v1866_v56 }
0x1807   :  { %v2558_v12 = vpop.eup %2557 }
0x1808   :  { %1869 = vrot.lane.b32.xlu0 %v2558_v12, %s2636_s14  ;;  %s2641_s14 = smov [#allocation12]  }
0x1809   :  { %s2051_s24 = sshll.u32 %s2641_s14, 4  ;;  %s2052_s24 = int_to_ptr.vmem [resolvable:$true] %s2051_s24 }
0x180a   :  { %p2608_p3 = scmp.lt.s32.totalorder %s2052_s24, %s2052_s24 }
0x180c   :  { %1880 = vrot.lane.b32.xlu0 %v3043_v22, %s2640_s7 }
0x187a   :  { %v1870_v13 = vpop.permute.xlu0 %1869 }
0x187b   :  { %v1872_v14 = vmul.f32 %v2556_v3, %v1870_v13 }
0x187d   :  { %1874 = vrot.lane.b32.xlu1 %v1872_v14, %s2637_s17  ;;  %s2603_s17 = scalar_lea.vmem %s2052_s24, 1024 }
0x187e   :  { %v1881_v15 = vpop.permute.xlu0 %1880  ;;  %p2604_p2 = scmp.ne.s32.totalorder %s2052_s24, %s2603_s17  ;;  %p2609_p4 = scmp.lt.s32.totalorder %s2603_s17, %s2603_s17 }
0x187f   :  { %1883 = vst.msk [vmem:[#allocation4] sm:$0xff] %vm63_vm1, %v1881_v15 }
0x1880   :  { %p2610_p5 = por %p2609_p4, %p2608_p3 }
0x1881   :  { %1886 = vrot.lane.b32.xlu1 %v1866_v56, %s2640_s7 }
0x1882   :  { %p2611_p6 = pnand %p2610_p5, %p2604_p2 }
0x18ef   :  { %v1875_v16 = vpop.permute.xlu1 %1874 }
0x18f0   :  { %1877 = vst.msk [vmem:[#allocation2 + $0x38] sm:$0xff] %vm63_vm1, %v1875_v16  ;;  %1884 = vst.msk [vmem:[#allocation5] sm:$0xff] %vm63_vm1, %v1875_v16 }
0x18f3   :  { %v1887_v41 = vpop.permute.xlu1 %1886 }
0x18f4   :  { %1889 = vst.msk [vmem:[#allocation6] sm:$0xff] %vm63_vm1, %v1887_v41 }
0x18f7   :  { %v1897_v17 = vld [vmem:[#allocation2 + $0x38] sm:$0xff] }
0x18f8   :  { %2296 = vmatmul.mubr.msk.f32.gmra.mrb[24].mxu0 %vm63_vm1, %v1897_v17 }
0x19cb   :  { %v2297_v18 = vpop.f32.mrb[24].mxu0 }
0x19cc   :  { %v2035_v20 = vadd.f32 %v2297_v18, %v2106_v58  ;;  %v2029_v21 = vpop.f32.mrb[25].mxu0 }
0x19cd   :  { %v2030_v22 = vadd.f32 %v2106_v58, %v2029_v21 }
0x19ce   :  { %2045 = vst [vmem:[#allocation12 + $0x38] sm:$0xff] %v2035_v20 }
0x19cf   :  { %2044 = vst [vmem:[#allocation12 + $0x30] sm:$0xff] %v2030_v22 }
0x19d0   :  { %2614 = shalt.err (!%p2611_p6)
}
0x19d1   :  { %s2615_s27 = scalar_lea.hbm %s3101_s8, 1024 }
0x19d2   :  { %p2616_p7 = scmp.ne.s32.totalorder %s3101_s8, %s2615_s27  ;;  %p2619_p8 = scmp.lt.u32.totalorder %s2615_s27, %s3101_s8 }
0x19d4   :  { %p2621_p9 = pnand %p2619_p8, %p2616_p7 }
0x19d6   :  { %2624 = shalt.err (!%p2621_p9)
}
0x19d7   :  { %2057 = dma.vmem_to_hbm [thread:$0]  %s2052_s24, 1024, %s3101_s8, [#allocation9], %s2632_s15, %s2632_s15, %s2633_s16  }
0x19d8   :  { %2629 = dma.done.wait [#allocation9], 1024  }
0x19d9   :  { %2630 = vsyncadd [#allocation9], 4294966272 }
0x19da   :  { %2061 = vsyncpa [#allocation8], 1 }
0x19db   :  { %2062 = vsyncpa [#allocation11], 1 }
0x19dc   :  { %2063 = vsyncpa [#allocation9], 1 }

</bundles_post_ra>
